<compile_context>
chip_gen: v7x
topology: tpu7x:2x2x1
jax: 0.10.0
libtpu: 0.0.40
codegen_flags: <defaults>
</compile_context>

<pallas_src>
import jax
import jax.numpy as jnp
from jax.experimental import pallas as pl
from jax.experimental.pallas import tpu as pltpu

# Model hyper-params (module defaults)
O_DIM = 1
H_LAYER_NUM = 1          # -> two hidden Linear+ReLU layers
Z_DIM = 50
H_DIM = 500
OUT_DIM = O_DIM * 784    # 784 (output written unpadded)

# Lane-aligned (padded) dims used inside the kernel for the hidden layers
Z_PAD = 64
H_PAD = 512


def decoder_kernel(z_ref, w0_ref, b0_ref, w1_ref, b1_ref, wo_ref, bo_ref, out_ref):
    # Layer 0: Linear(z -> h) + ReLU.  bf16 x bf16 on the MXU, f32 accumulate.
    h = jnp.dot(z_ref[...], w0_ref[...], preferred_element_type=jnp.float32)
    h = jnp.maximum(h + b0_ref[...], 0.0)
    # Layer 1: Linear(h -> h) + ReLU (LHS cast to bf16 for the MXU fast path).
    h = jnp.dot(h.astype(jnp.bfloat16), w1_ref[...],
                preferred_element_type=jnp.float32)
    h = jnp.maximum(h + b1_ref[...], 0.0)
    # Output head: Linear(h -> o_dim*784), no activation, f32 store.
    out = jnp.dot(h.astype(jnp.bfloat16), wo_ref[...],
                  preferred_element_type=jnp.float32)
    out_ref[...] = out + bo_ref[...]


def _round_up(x, m):
    return ((x + m - 1) // m) * m


def _choose_tile(B, tile_b):
    """Pick (tile_b, num_tiles).  Tiny batches: one tile whose sublane dim
    equals the full batch dim (no batch padding -> no wrapper slice).  Larger
    batches: >= 2 grid steps (megacore on v7x), tile a multiple of 16 (bf16
    sublane packing), capped at `tile_b`."""
    if B <= 32:
        return B, 1
    tb = min(tile_b, max(16, _round_up(-(-B // 2), 16)))
    return tb, -(-B // tb)


def densenet_decoder_pallas(z, params, tile_b=512):
    """z: (B, Z_DIM) f32.  params: lane-padded (bf16 weights / f32 biases).
    Returns (B, O_DIM, 28, 28) f32."""
    w0, b0, w1, b1, wo, bo = params
    B = z.shape[0]

    tb, num_tiles = _choose_tile(B, tile_b)
    b_pad = num_tiles * tb

    # Pad z to (b_pad, Z_PAD) and store bf16 (halved z DMA, MXU-ready LHS).
    # Padded cols hit zero weight rows; padded batch rows are sliced off.
    z_p = jnp.pad(z, ((0, b_pad - B), (0, Z_PAD - Z_DIM))).astype(jnp.bfloat16)

    const = lambda i: (0, 0)   # weights/biases: VMEM-resident, fetched once
    out_flat = pl.pallas_call(
        decoder_kernel,
        out_shape=jax.ShapeDtypeStruct((b_pad, OUT_DIM), jnp.float32),
        grid=(num_tiles,),
        in_specs=[
            pl.BlockSpec((tb, Z_PAD), lambda i: (i, 0)),     # z tile (bf16)
            pl.BlockSpec((Z_PAD, H_PAD), const),             # w0 (bf16)
            pl.BlockSpec((1, H_PAD), const),                 # b0 (f32)
            pl.BlockSpec((H_PAD, H_PAD), const),             # w1 (bf16)
            pl.BlockSpec((1, H_PAD), const),                 # b1 (f32)
            pl.BlockSpec((H_PAD, OUT_DIM), const),           # wo (bf16)
            pl.BlockSpec((1, OUT_DIM), const),               # bo (f32)
        ],
        out_specs=pl.BlockSpec((tb, OUT_DIM), lambda i: (i, 0)),
        compiler_params=pltpu.CompilerParams(
            dimension_semantics=("parallel",)),              # megacore on v7x
    )(z_p, w0, b0, w1, b1, wo, bo)

    if b_pad != B:                    # only when the batch doesn't tile evenly
        out_flat = out_flat[:B]
    # view(-1, o_dim, 28, 28): metadata-only reshape (output already 784-wide).
    return out_flat.reshape(-1, O_DIM, 28, 28)


def init_params(key):
    """Deterministic synthetic weights.

    Stored as (in, out) so the kernel computes x @ W + b (== PyTorch's
    x @ W.T + b).  Weights are bf16 (memory-bound win), biases f32.  The
    hidden dims are zero-padded to lane multiples; the output dim stays 784
    so the kernel writes the exact output shape."""
    k0, k1, k2, k3, k4, k5 = jax.random.split(key, 6)
    s0 = 1.0 / jnp.sqrt(Z_DIM)
    s1 = 1.0 / jnp.sqrt(H_DIM)

    w0 = (jax.random.normal(k0, (Z_DIM, H_DIM), jnp.float32) * s0).astype(jnp.bfloat16)
    b0 = jax.random.normal(k1, (1, H_DIM), jnp.float32) * s0
    w1 = (jax.random.normal(k2, (H_DIM, H_DIM), jnp.float32) * s1).astype(jnp.bfloat16)
    b1 = jax.random.normal(k3, (1, H_DIM), jnp.float32) * s1
    wo = (jax.random.normal(k4, (H_DIM, OUT_DIM), jnp.float32) * s1).astype(jnp.bfloat16)
    bo = jax.random.normal(k5, (1, OUT_DIM), jnp.float32) * s1

    def pad2(x, r, c):
        return jnp.pad(x, ((0, r - x.shape[0]), (0, c - x.shape[1])))

    return (
        pad2(w0, Z_PAD, H_PAD), pad2(b0, 1, H_PAD),
        pad2(w1, H_PAD, H_PAD), pad2(b1, 1, H_PAD),
        pad2(wo, H_PAD, OUT_DIM), bo,
    )


def densenet_decoder_ref(z, params):
    """Pure-JAX reference mirroring the PyTorch forward with the SAME mixed
    precision as the kernel (bf16 operands, f32 accumulation)."""
    w0, b0, w1, b1, wo, bo = params
    w0 = w0[:Z_DIM, :H_DIM]
    w1 = w1[:H_DIM, :H_DIM]
    wo = wo[:H_DIM, :OUT_DIM]
    b0 = b0[:, :H_DIM]
    b1 = b1[:, :H_DIM]
    h = jnp.dot(z.astype(jnp.bfloat16), w0, preferred_element_type=jnp.float32)
    h = jnp.maximum(h + b0, 0.0)
    h = jnp.dot(h.astype(jnp.bfloat16), w1, preferred_element_type=jnp.float32)
    h = jnp.maximum(h + b1, 0.0)
    x = jnp.dot(h.astype(jnp.bfloat16), wo, preferred_element_type=jnp.float32) + bo
    return x.reshape(-1, O_DIM, 28, 28)


if __name__ == "__main__":
    key = jax.random.PRNGKey(0)
    kp, kz = jax.random.split(key)
    params = init_params(kp)

    B = 8
    z = jax.random.normal(kz, (B, Z_DIM), jnp.float32)

    out = densenet_decoder_pallas(z, params)
    out = jax.block_until_ready(out)

    ref = densenet_decoder_ref(z, params)
    assert out.shape == (B, O_DIM, 28, 28), out.shape
    assert jnp.allclose(out, ref, atol=2e-3, rtol=2e-3), "mismatch vs reference"

    print("KERNEL_OK")
</pallas_src>

<mosaic_0001>
module attributes {stable_mosaic.version = 11 : i64} {
  func.func @decoder_kernel(%arg0: i32, %arg1: memref<8x64xbf16, #tpu.memory_space<vmem>>, %arg2: memref<64x512xbf16, #tpu.memory_space<vmem>>, %arg3: memref<1x512xf32, #tpu.memory_space<vmem>>, %arg4: memref<512x512xbf16, #tpu.memory_space<vmem>>, %arg5: memref<1x512xf32, #tpu.memory_space<vmem>>, %arg6: memref<512x784xbf16, #tpu.memory_space<vmem>>, %arg7: memref<1x784xf32, #tpu.memory_space<vmem>>, %arg8: memref<8x784xf32, #tpu.memory_space<vmem>>) attributes {dimension_semantics = [#tpu.dimension_semantics<parallel>], iteration_bounds = array<i64: 1>, scalar_prefetch = 0 : i64, scratch_operands = 0 : i64, tpu.core_type = #tpu.core_type<tc>, window_params = [{transform_indices = @transform_0, window_bounds = array<i64: 8, 64>}, {pipeline_mode = #tpu.pipeline_mode<synchronous>, transform_indices = @transform_1, window_bounds = array<i64: 64, 512>}, {pipeline_mode = #tpu.pipeline_mode<synchronous>, transform_indices = @transform_2, window_bounds = array<i64: 1, 512>}, {pipeline_mode = #tpu.pipeline_mode<synchronous>, transform_indices = @transform_3, window_bounds = array<i64: 512, 512>}, {pipeline_mode = #tpu.pipeline_mode<synchronous>, transform_indices = @transform_4, window_bounds = array<i64: 1, 512>}, {pipeline_mode = #tpu.pipeline_mode<synchronous>, transform_indices = @transform_5, window_bounds = array<i64: 512, 784>}, {pipeline_mode = #tpu.pipeline_mode<synchronous>, transform_indices = @transform_6, window_bounds = array<i64: 1, 784>}, {transform_indices = @transform_7, window_bounds = array<i64: 8, 784>}]} {
    %c0 = arith.constant 0 : index
    %c0_0 = arith.constant 0 : index
    %0 = vector.load %arg1[%c0, %c0_0] : memref<8x64xbf16, #tpu.memory_space<vmem>>, vector<8x64xbf16>
    %c0_1 = arith.constant 0 : index
    %c0_2 = arith.constant 0 : index
    %1 = vector.load %arg2[%c0_1, %c0_2] : memref<64x512xbf16, #tpu.memory_space<vmem>>, vector<64x512xbf16>
    %cst = arith.constant dense<0.000000e+00> : vector<8x512xf32>
    %2 = tpu.matmul %0, %1, %cst {dimension_numbers = #tpu.dot_dimension_numbers<[1], [0], [0], [1], [0, 0, 1, 1], [], []>} : vector<8x64xbf16>, vector<64x512xbf16>, vector<8x512xf32> -> vector<8x512xf32>
    %c0_3 = arith.constant 0 : index
    %c0_4 = arith.constant 0 : index
    %3 = vector.load %arg3[%c0_3, %c0_4] : memref<1x512xf32, #tpu.memory_space<vmem>>, vector<1x512xf32>
    %4 = vector.broadcast %3 : vector<1x512xf32> to vector<8x512xf32>
    %5 = arith.addf %2, %4 : vector<8x512xf32>
    %cst_5 = arith.constant 0.000000e+00 : f32
    %6 = vector.broadcast %cst_5 : f32 to vector<8x512xf32>
    %7 = arith.maximumf %5, %6 : vector<8x512xf32>
    %8 = arith.truncf %7 : vector<8x512xf32> to vector<8x512xbf16>
    %c0_6 = arith.constant 0 : index
    %c0_7 = arith.constant 0 : index
    %9 = vector.load %arg4[%c0_6, %c0_7] : memref<512x512xbf16, #tpu.memory_space<vmem>>, vector<512x512xbf16>
    %cst_8 = arith.constant dense<0.000000e+00> : vector<8x512xf32>
    %10 = tpu.matmul %8, %9, %cst_8 {dimension_numbers = #tpu.dot_dimension_numbers<[1], [0], [0], [1], [0, 0, 1, 1], [], []>} : vector<8x512xbf16>, vector<512x512xbf16>, vector<8x512xf32> -> vector<8x512xf32>
    %c0_9 = arith.constant 0 : index
    %c0_10 = arith.constant 0 : index
    %11 = vector.load %arg5[%c0_9, %c0_10] : memref<1x512xf32, #tpu.memory_space<vmem>>, vector<1x512xf32>
    %12 = vector.broadcast %11 : vector<1x512xf32> to vector<8x512xf32>
    %13 = arith.addf %10, %12 : vector<8x512xf32>
    %cst_11 = arith.constant 0.000000e+00 : f32
    %14 = vector.broadcast %cst_11 : f32 to vector<8x512xf32>
    %15 = arith.maximumf %13, %14 : vector<8x512xf32>
    %16 = arith.truncf %15 : vector<8x512xf32> to vector<8x512xbf16>
    %c0_12 = arith.constant 0 : index
    %c0_13 = arith.constant 0 : index
    %17 = vector.load %arg6[%c0_12, %c0_13] : memref<512x784xbf16, #tpu.memory_space<vmem>>, vector<512x784xbf16>
    %cst_14 = arith.constant dense<0.000000e+00> : vector<8x784xf32>
    %18 = tpu.matmul %16, %17, %cst_14 {dimension_numbers = #tpu.dot_dimension_numbers<[1], [0], [0], [1], [0, 0, 1, 1], [], []>} : vector<8x512xbf16>, vector<512x784xbf16>, vector<8x784xf32> -> vector<8x784xf32>
    %c0_15 = arith.constant 0 : index
    %c0_16 = arith.constant 0 : index
    %19 = vector.load %arg7[%c0_15, %c0_16] : memref<1x784xf32, #tpu.memory_space<vmem>>, vector<1x784xf32>
    %20 = vector.broadcast %19 : vector<1x784xf32> to vector<8x784xf32>
    %21 = arith.addf %18, %20 : vector<8x784xf32>
    %c0_17 = arith.constant 0 : index
    %c0_18 = arith.constant 0 : index
    %22 = vector.load %arg8[%c0_17, %c0_18] : memref<8x784xf32, #tpu.memory_space<vmem>>, vector<8x784xf32>
    tpu.vector_store %arg8[%c0_17, %c0_18], %21 {strides = array<i32>} : memref<8x784xf32, #tpu.memory_space<vmem>>, vector<8x784xf32>,
    return
  }
  func.func @transform_0(%arg0: i32) -> (i32, i32) {
    %c0_i32 = arith.constant 0 : i32
    %c0_i32_0 = arith.constant 0 : i32
    return %arg0, %c0_i32 : i32, i32
  }
  func.func @transform_1(%arg0: i32) -> (i32, i32) {
    %c0_i32 = arith.constant 0 : i32
    %c0_i32_0 = arith.constant 0 : i32
    %c0_i32_1 = arith.constant 0 : i32
    return %c0_i32, %c0_i32_0 : i32, i32
  }
  func.func @transform_2(%arg0: i32) -> (i32, i32) {
    %c0_i32 = arith.constant 0 : i32
    %c0_i32_0 = arith.constant 0 : i32
    %c0_i32_1 = arith.constant 0 : i32
    return %c0_i32, %c0_i32_0 : i32, i32
  }
  func.func @transform_3(%arg0: i32) -> (i32, i32) {
    %c0_i32 = arith.constant 0 : i32
    %c0_i32_0 = arith.constant 0 : i32
    %c0_i32_1 = arith.constant 0 : i32
    return %c0_i32, %c0_i32_0 : i32, i32
  }
  func.func @transform_4(%arg0: i32) -> (i32, i32) {
    %c0_i32 = arith.constant 0 : i32
    %c0_i32_0 = arith.constant 0 : i32
    %c0_i32_1 = arith.constant 0 : i32
    return %c0_i32, %c0_i32_0 : i32, i32
  }
  func.func @transform_5(%arg0: i32) -> (i32, i32) {
    %c0_i32 = arith.constant 0 : i32
    %c0_i32_0 = arith.constant 0 : i32
    %c0_i32_1 = arith.constant 0 : i32
    return %c0_i32, %c0_i32_0 : i32, i32
  }
  func.func @transform_6(%arg0: i32) -> (i32, i32) {
    %c0_i32 = arith.constant 0 : i32
    %c0_i32_0 = arith.constant 0 : i32
    %c0_i32_1 = arith.constant 0 : i32
    return %c0_i32, %c0_i32_0 : i32, i32
  }
  func.func @transform_7(%arg0: i32) -> (i32, i32) {
    %c0_i32 = arith.constant 0 : i32
    %c0_i32_0 = arith.constant 0 : i32
    return %arg0, %c0_i32 : i32, i32
  }
}

</mosaic_0001>

<bundles_post_ra>
// kernel: tpu_custom_call.1
= control target key start
LH: loop header
LB: loop body
LE: loop exit
PB: predicated region body
PF: predicated region fallthrough
CT: control target
= control target key end

     0   :  { %v4002_v2 = vmov 0   ;;  %vm147_vm0 = vcmask 523264   ;;  %s5245_s0 = inlined_call_operand.vmem [shape: bf16[8,64], index: 0, kind: input, shape index: {}]   ;;  %s5246_s1 = inlined_call_operand.vmem [shape: bf16[64,512], index: 1, kind: input, shape index: {}]   ;;  %s5247_s2 = inlined_call_operand.vmem [shape: f32[1,512], index: 2, kind: input, shape index: {}]   ;;  %s5248_s3 = inlined_call_operand.vmem [shape: bf16[512,512], index: 3, kind: input, shape index: {}]   ;;  %s5249_s4 = inlined_call_operand.vmem [shape: f32[1,512], index: 4, kind: input, shape index: {}]   ;;  %s5250_s5 = inlined_call_operand.vmem [shape: bf16[512,784], index: 5, kind: input, shape index: {}]   ;;  %s5251_s6 = inlined_call_operand.vmem [shape: f32[1,784], index: 6, kind: input, shape index: {}]   ;;  %s5252_s7 = inlined_call_operand.hbm [shape: f32[8,784], index: 7, kind: output, shape index: {}]  }
   0x1   :  { %v3442_v0 = vld [vmem:[%s5246_s1 + $0x4] ss:$16 sps:$4 sm:$0xff]   ;;  %v3444_v1 = vld [vmem:[%s5246_s1] ss:$16 sps:$4 sm:$0xff]   ;;  %183 = vmatprep.mubr.bf16.mxu1 %v4002_v2  ;;  %v3456_v10 = vld [vmem:[%s5246_s1 + $0xc] ss:$16 sps:$4 sm:$0xff]  }
   0x2   :  { %151 = vmatprep.subr.bf16.mxu1 %v3442_v0  ;;  %v3445_v3 = vld [vmem:[%s5246_s1 + $0x24] ss:$16 sps:$4 sm:$0xff]   ;;  %v3447_v4 = vld [vmem:[%s5246_s1 + $0x20] ss:$16 sps:$4 sm:$0xff]   ;;  %v3454_v14 = vld [vmem:[%s5246_s1 + $0x8] ss:$16 sps:$4 sm:$0xff]  }
   0x3   :  { %152 = vmatpush1.bf16.msra.mxu1 %v3444_v1  ;;  %v3448_v5 = vld [vmem:[%s5246_s1 + $0x44] ss:$16 sps:$4 sm:$0xff]   ;;  %v3450_v6 = vld [vmem:[%s5246_s1 + $0x40] ss:$16 sps:$4 sm:$0xff]   ;;  %v3459_v15 = vld [vmem:[%s5246_s1 + $0x2c] ss:$16 sps:$4 sm:$0xff]  }
   0x4   :  { %153 = vmatprep.subr.bf16.mxu1 %v3445_v3  ;;  %v3451_v7 = vld [vmem:[%s5246_s1 + $0x64] ss:$16 sps:$4 sm:$0xff]   ;;  %v3453_v8 = vld [vmem:[%s5246_s1 + $0x60] ss:$16 sps:$4 sm:$0xff]   ;;  %v3457_v18 = vld [vmem:[%s5246_s1 + $0x28] ss:$16 sps:$4 sm:$0xff]  }
   0x5   :  { %v3466_v9 = vld [vmem:[%s5248_s3 + $0x4] ss:$16 sps:$4 sm:$0xff]   ;;  %v28_v11 = vld [vmem:[%s5245_s0] sm:$0xf]  ;;  %v3462_v19 = vld [vmem:[%s5246_s1 + $0x4c] ss:$16 sps:$4 sm:$0xff]  }
   0x6   :  { %1031 = vmatprep.subr.bf16.mxu0 %v3466_v9  ;;  %v3471_v12 = vld [vmem:[%s5248_s3] ss:$16 sps:$4 sm:$0xff]   ;;  %v3472_v13 = vld [vmem:[%s5248_s3 + $0x24] ss:$16 sps:$4 sm:$0xff]   ;;  %v3460_v22 = vld [vmem:[%s5246_s1 + $0x48] ss:$16 sps:$4 sm:$0xff]  }
   0x7   :  { %154 = vmatpush1.bf16.msra.mxu1 %v3447_v4  ;;  %1032 = vmatpush1.bf16.msra.mxu0 %v3471_v12  ;;  %v3477_v16 = vld [vmem:[%s5248_s3 + $0x20] ss:$16 sps:$4 sm:$0xff]   ;;  %v3478_v17 = vld [vmem:[%s5248_s3 + $0x44] ss:$16 sps:$4 sm:$0xff]   ;;  %v3465_v23 = vld [vmem:[%s5246_s1 + $0x6c] ss:$16 sps:$4 sm:$0xff]  }
   0x8   :  { %155 = vmatprep.subr.bf16.mxu1 %v3448_v5  ;;  %1033 = vmatprep.subr.bf16.mxu0 %v3472_v13  ;;  %v3483_v20 = vld [vmem:[%s5248_s3 + $0x40] ss:$16 sps:$4 sm:$0xff]   ;;  %v3484_v21 = vld [vmem:[%s5248_s3 + $0x64] ss:$16 sps:$4 sm:$0xff]   ;;  %v3463_v26 = vld [vmem:[%s5246_s1 + $0x68] ss:$16 sps:$4 sm:$0xff]  }
   0x9   :  { %v3489_v24 = vld [vmem:[%s5248_s3 + $0x60] ss:$16 sps:$4 sm:$0xff]   ;;  %v3490_v25 = vld [vmem:[%s5248_s3 + $0x84] ss:$16 sps:$4 sm:$0xff]   ;;  %v3470_v27 = vld [vmem:[%s5248_s3 + $0xc] ss:$16 sps:$4 sm:$0xff]  }
   0xa   :  { %v3495_v28 = vld [vmem:[%s5248_s3 + $0x80] ss:$16 sps:$4 sm:$0xff]   ;;  %v3496_v29 = vld [vmem:[%s5248_s3 + $0xa4] ss:$16 sps:$4 sm:$0xff]   ;;  %v3468_v30 = vld [vmem:[%s5248_s3 + $0x8] ss:$16 sps:$4 sm:$0xff]  }
   0xb   :  { %156 = vmatpush1.bf16.msra.mxu1 %v3450_v6  ;;  %1034 = vmatpush1.bf16.msra.mxu0 %v3477_v16  ;;  %v3476_v31 = vld [vmem:[%s5248_s3 + $0x2c] ss:$16 sps:$4 sm:$0xff]   ;;  %v3501_v32 = vld [vmem:[%s5248_s3 + $0xa0] ss:$16 sps:$4 sm:$0xff]   ;;  %v3502_v33 = vld [vmem:[%s5248_s3 + $0xc4] ss:$16 sps:$4 sm:$0xff]  }
   0xc   :  { %157 = vmatprep.subr.bf16.mxu1 %v3451_v7  ;;  %1035 = vmatprep.subr.bf16.mxu0 %v3478_v17  ;;  %v3474_v34 = vld [vmem:[%s5248_s3 + $0x28] ss:$16 sps:$4 sm:$0xff]   ;;  %v3482_v35 = vld [vmem:[%s5248_s3 + $0x4c] ss:$16 sps:$4 sm:$0xff]   ;;  %v3507_v36 = vld [vmem:[%s5248_s3 + $0xc0] ss:$16 sps:$4 sm:$0xff]  }
   0xd   :  { %v3508_v37 = vld [vmem:[%s5248_s3 + $0xe4] ss:$16 sps:$4 sm:$0xff]   ;;  %v3480_v38 = vld [vmem:[%s5248_s3 + $0x48] ss:$16 sps:$4 sm:$0xff]   ;;  %v3488_v39 = vld [vmem:[%s5248_s3 + $0x6c] ss:$16 sps:$4 sm:$0xff]  }
   0xe   :  { %v3513_v40 = vld [vmem:[%s5248_s3 + $0xe0] ss:$16 sps:$4 sm:$0xff]   ;;  %v3514_v41 = vld [vmem:[%s5248_s3 + $0x104] ss:$16 sps:$4 sm:$0xff]   ;;  %v3486_v42 = vld [vmem:[%s5248_s3 + $0x68] ss:$16 sps:$4 sm:$0xff]  }
   0xf   :  { %158 = vmatpush1.bf16.msra.mxu1 %v3453_v8  ;;  %1036 = vmatpush1.bf16.msra.mxu0 %v3483_v20  ;;  %v3494_v43 = vld [vmem:[%s5248_s3 + $0x8c] ss:$16 sps:$4 sm:$0xff]   ;;  %v3519_v44 = vld [vmem:[%s5248_s3 + $0x100] ss:$16 sps:$4 sm:$0xff]   ;;  %v3520_v45 = vld [vmem:[%s5248_s3 + $0x124] ss:$16 sps:$4 sm:$0xff]  }
  0x10   :  { %192 = vmatprep.subr.bf16.mxu1 %v3456_v10  ;;  %1037 = vmatprep.subr.bf16.mxu0 %v3484_v21  ;;  %v3492_v46 = vld [vmem:[%s5248_s3 + $0x88] ss:$16 sps:$4 sm:$0xff]   ;;  %v3500_v47 = vld [vmem:[%s5248_s3 + $0xac] ss:$16 sps:$4 sm:$0xff]   ;;  %v3525_v48 = vld [vmem:[%s5248_s3 + $0x120] ss:$16 sps:$4 sm:$0xff]  }
  0x11   :  { %v3526_v49 = vld [vmem:[%s5248_s3 + $0x144] ss:$16 sps:$4 sm:$0xff]   ;;  %v3498_v50 = vld [vmem:[%s5248_s3 + $0xa8] ss:$16 sps:$4 sm:$0xff]   ;;  %v3506_v51 = vld [vmem:[%s5248_s3 + $0xcc] ss:$16 sps:$4 sm:$0xff]  }
  0x12   :  { %3012 = vmatmul.mubr.msk.bf16.vlgmr.msra.gmra.mrb[0].mxu1 %vm147_vm0, %v28_v11  ;;  %v3531_v52 = vld [vmem:[%s5248_s3 + $0x140] ss:$16 sps:$4 sm:$0xff]   ;;  %v3532_v53 = vld [vmem:[%s5248_s3 + $0x164] ss:$16 sps:$4 sm:$0xff]   ;;  %v3504_v54 = vld [vmem:[%s5248_s3 + $0xc8] ss:$16 sps:$4 sm:$0xff]  }
  0x13   :  { %193 = vmatpush1.bf16.msra.mxu1 %v3454_v14  ;;  %224 = vmatprep.mubr.bf16.mxu1 %v4002_v2  ;;  %v3512_v55 = vld [vmem:[%s5248_s3 + $0xec] ss:$16 sps:$4 sm:$0xff]   ;;  %v3537_v56 = vld [vmem:[%s5248_s3 + $0x160] ss:$16 sps:$4 sm:$0xff]   ;;  %v3538_v57 = vld [vmem:[%s5248_s3 + $0x184] ss:$16 sps:$4 sm:$0xff]  }
  0x14   :  { %194 = vmatprep.subr.bf16.mxu1 %v3459_v15  ;;  %1038 = vmatpush1.bf16.msra.mxu0 %v3489_v24  ;;  %v3510_v58 = vld [vmem:[%s5248_s3 + $0xe8] ss:$16 sps:$4 sm:$0xff]   ;;  %v3518_v59 = vld [vmem:[%s5248_s3 + $0x10c] ss:$16 sps:$4 sm:$0xff]   ;;  %v3543_v60 = vld [vmem:[%s5248_s3 + $0x180] ss:$16 sps:$4 sm:$0xff]  }
  0x15   :  { %1039 = vmatprep.subr.bf16.mxu0 %v3490_v25  ;;  %v3544_v61 = vld [vmem:[%s5248_s3 + $0x1a4] ss:$16 sps:$4 sm:$0xff]   ;;  %v3516_v62 = vld [vmem:[%s5248_s3 + $0x108] ss:$16 sps:$4 sm:$0xff]   ;;  %v3524_v63 = vld [vmem:[%s5248_s3 + $0x12c] ss:$16 sps:$4 sm:$0xff]  }
  0x16   :  { %v3549_v0 = vld [vmem:[%s5248_s3 + $0x1a0] ss:$16 sps:$4 sm:$0xff]   ;;  %v3522_v1 = vld [vmem:[%s5248_s3 + $0x128] ss:$16 sps:$4 sm:$0xff]   ;;  %v3530_v2 = vld [vmem:[%s5248_s3 + $0x14c] ss:$16 sps:$4 sm:$0xff]  }
  0x17   :  { %195 = vmatpush1.bf16.msra.mxu1 %v3457_v18  ;;  %v3528_v3 = vld [vmem:[%s5248_s3 + $0x148] ss:$16 sps:$4 sm:$0xff]   ;;  %v3536_v4 = vld [vmem:[%s5248_s3 + $0x16c] ss:$16 sps:$4 sm:$0xff]   ;;  %v3550_v10 = vld [vmem:[%s5248_s3 + $0x1c4] ss:$16 sps:$4 sm:$0xff]  }
  0x18   :  { %196 = vmatprep.subr.bf16.mxu1 %v3462_v19  ;;  %1040 = vmatpush1.bf16.msra.mxu0 %v3495_v28  ;;  %v3534_v5 = vld [vmem:[%s5248_s3 + $0x168] ss:$16 sps:$4 sm:$0xff]   ;;  %v3542_v6 = vld [vmem:[%s5248_s3 + $0x18c] ss:$16 sps:$4 sm:$0xff]   ;;  %v3555_v13 = vld [vmem:[%s5248_s3 + $0x1c0] ss:$16 sps:$4 sm:$0xff]  }
  0x19   :  { %1041 = vmatprep.subr.bf16.mxu0 %v3496_v29  ;;  %v3540_v7 = vld [vmem:[%s5248_s3 + $0x188] ss:$16 sps:$4 sm:$0xff]   ;;  %v3548_v8 = vld [vmem:[%s5248_s3 + $0x1ac] ss:$16 sps:$4 sm:$0xff]   ;;  %v3556_v14 = vld [vmem:[%s5248_s3 + $0x1e4] ss:$16 sps:$4 sm:$0xff]  }
  0x1a   :  { %v3546_v9 = vld [vmem:[%s5248_s3 + $0x1a8] ss:$16 sps:$4 sm:$0xff]   ;;  %v3560_v15 = vld [vmem:[%s5248_s3 + $0x1ec] ss:$16 sps:$4 sm:$0xff]   ;;  %v3561_v17 = vld [vmem:[%s5248_s3 + $0x1e0] ss:$16 sps:$4 sm:$0xff]  }
  0x1b   :  { %197 = vmatpush1.bf16.msra.mxu1 %v3460_v22  ;;  %v3552_v12 = vld [vmem:[%s5248_s3 + $0x1c8] ss:$16 sps:$4 sm:$0xff]   ;;  %v3564_v18 = vld [vmem:[%s5248_s3 + $0x204] ss:$16 sps:$4 sm:$0xff]   ;;  %v3567_v19 = vld [vmem:[%s5248_s3 + $0x20c] ss:$16 sps:$4 sm:$0xff]  }
  0x1c   :  { %198 = vmatprep.subr.bf16.mxu1 %v3465_v23  ;;  %1042 = vmatpush1.bf16.msra.mxu0 %v3501_v32  ;;  %v3558_v16 = vld [vmem:[%s5248_s3 + $0x1e8] ss:$16 sps:$4 sm:$0xff]  }
  0x1d   :  { %1043 = vmatprep.subr.bf16.mxu0 %v3502_v33 }
  0x1f   :  { %199 = vmatpush1.bf16.msra.mxu1 %v3463_v26 }
  0x20   :  { %1113 = vmatprep.subr.bf16.mxu1 %v3470_v27  ;;  %1044 = vmatpush1.bf16.msra.mxu0 %v3507_v36 }
  0x21   :  { %1045 = vmatprep.subr.bf16.mxu0 %v3508_v37 }
  0x22   :  { %3013 = vmatmul.mubr.msk.bf16.vlgmr.msra.gmra.mrb[4].mxu1 %vm147_vm0, %v28_v11  ;;  %v3554_v11 = vld [vmem:[%s5248_s3 + $0x1cc] ss:$16 sps:$4 sm:$0xff]  }
  0x23   :  { %1114 = vmatpush1.bf16.msra.mxu1 %v3468_v30 }
  0x24   :  { %1115 = vmatprep.subr.bf16.mxu1 %v3476_v31  ;;  %1046 = vmatpush1.bf16.msra.mxu0 %v3513_v40 }
  0x25   :  { %1047 = vmatprep.subr.bf16.mxu0 %v3514_v41 }
  0x27   :  { %1116 = vmatpush1.bf16.msra.mxu1 %v3474_v34 }
  0x28   :  { %1117 = vmatprep.subr.bf16.mxu1 %v3482_v35  ;;  %1048 = vmatpush1.bf16.msra.mxu0 %v3519_v44 }
  0x29   :  { %1049 = vmatprep.subr.bf16.mxu0 %v3520_v45 }
  0x2b   :  { %1118 = vmatpush1.bf16.msra.mxu1 %v3480_v38 }
  0x2c   :  { %1119 = vmatprep.subr.bf16.mxu1 %v3488_v39  ;;  %1050 = vmatpush1.bf16.msra.mxu0 %v3525_v48 }
  0x2d   :  { %1051 = vmatprep.subr.bf16.mxu0 %v3526_v49 }
  0x2f   :  { %1120 = vmatpush1.bf16.msra.mxu1 %v3486_v42 }
  0x30   :  { %1121 = vmatprep.subr.bf16.mxu1 %v3494_v43  ;;  %1052 = vmatpush1.bf16.msra.mxu0 %v3531_v52 }
  0x31   :  { %1053 = vmatprep.subr.bf16.mxu0 %v3532_v53 }
  0x33   :  { %1122 = vmatpush1.bf16.msra.mxu1 %v3492_v46 }
  0x34   :  { %1123 = vmatprep.subr.bf16.mxu1 %v3500_v47  ;;  %1054 = vmatpush1.bf16.msra.mxu0 %v3537_v56 }
  0x35   :  { %1055 = vmatprep.subr.bf16.mxu0 %v3538_v57 }
  0x37   :  { %1124 = vmatpush1.bf16.msra.mxu1 %v3498_v50 }
  0x38   :  { %1125 = vmatprep.subr.bf16.mxu1 %v3506_v51  ;;  %1056 = vmatpush1.bf16.msra.mxu0 %v3543_v60 }
  0x39   :  { %1057 = vmatprep.subr.bf16.mxu0 %v3544_v61 }
  0x3b   :  { %1126 = vmatpush1.bf16.msra.mxu1 %v3504_v54 }
  0x3c   :  { %1127 = vmatprep.subr.bf16.mxu1 %v3512_v55  ;;  %1058 = vmatpush1.bf16.msra.mxu0 %v3549_v0 }
  0x3d   :  { %1059 = vmatprep.subr.bf16.mxu0 %v3550_v10 }
  0x3f   :  { %1128 = vmatpush1.bf16.msra.mxu1 %v3510_v58 }
  0x40   :  { %1129 = vmatprep.subr.bf16.mxu1 %v3518_v59  ;;  %1060 = vmatpush1.bf16.msra.mxu0 %v3555_v13 }
  0x41   :  { %1061 = vmatprep.subr.bf16.mxu0 %v3556_v14 }
  0x43   :  { %1130 = vmatpush1.bf16.msra.mxu1 %v3516_v62 }
  0x44   :  { %1131 = vmatprep.subr.bf16.mxu1 %v3524_v63  ;;  %1062 = vmatpush1.bf16.msra.mxu0 %v3561_v17 }
  0x45   :  { %1072 = vmatprep.subr.bf16.mxu0 %v3564_v18 }
  0x47   :  { %1132 = vmatpush1.bf16.msra.mxu1 %v3522_v1 }
  0x48   :  { %1133 = vmatprep.subr.bf16.mxu1 %v3530_v2 }
  0x4b   :  { %1134 = vmatpush1.bf16.msra.mxu1 %v3528_v3 }
  0x4c   :  { %1135 = vmatprep.subr.bf16.mxu1 %v3536_v4 }
  0x4f   :  { %1136 = vmatpush1.bf16.msra.mxu1 %v3534_v5 }
  0x50   :  { %1137 = vmatprep.subr.bf16.mxu1 %v3542_v6 }
  0x53   :  { %1138 = vmatpush1.bf16.msra.mxu1 %v3540_v7 }
  0x54   :  { %1139 = vmatprep.subr.bf16.mxu1 %v3548_v8 }
  0x57   :  { %1140 = vmatpush1.bf16.msra.mxu1 %v3546_v9 }
  0x58   :  { %1141 = vmatprep.subr.bf16.mxu1 %v3554_v11 }
  0x5b   :  { %1142 = vmatpush1.bf16.msra.mxu1 %v3552_v12 }
  0x5c   :  { %1143 = vmatprep.subr.bf16.mxu1 %v3560_v15 }
  0x5f   :  { %1144 = vmatpush1.bf16.msra.mxu1 %v3558_v16 }
  0x60   :  { %1154 = vmatprep.subr.bf16.mxu1 %v3567_v19 }
  0x61   :  { %12 = vsyncpa [#allocation3], 0  ;;  %v47_v20 = vlaneseq  ;;  %v4303_v23 = vld [vmem:[%s5247_s2] sm:$0xf]  ;;  %v3565_v37 = vld [vmem:[%s5248_s3 + $0x208] ss:$16 sps:$4 sm:$0xff]  }
  0x62   :  { %v3562_v36 = vld [vmem:[%s5248_s3 + $0x200] ss:$16 sps:$4 sm:$0xff]   ;;  %v3570_v39 = vld [vmem:[%s5248_s3 + $0x224] ss:$16 sps:$4 sm:$0xff]   ;;  %v3573_v40 = vld [vmem:[%s5248_s3 + $0x22c] ss:$16 sps:$4 sm:$0xff]  }
  0x63   :  { %v4295_v21 = vshrl.u32 %v47_v20, 7  ;;  %v3568_v41 = vld [vmem:[%s5248_s3 + $0x220] ss:$16 sps:$4 sm:$0xff]   ;;  %v3571_v42 = vld [vmem:[%s5248_s3 + $0x228] ss:$16 sps:$4 sm:$0xff]   ;;  %vm2980_vm1 = vcmask 130048  }
  0x64   :  { %v3576_v44 = vld [vmem:[%s5248_s3 + $0x244] ss:$16 sps:$4 sm:$0xff]   ;;  %v3579_v45 = vld [vmem:[%s5248_s3 + $0x24c] ss:$16 sps:$4 sm:$0xff]   ;;  %v3574_v46 = vld [vmem:[%s5248_s3 + $0x240] ss:$16 sps:$4 sm:$0xff]  }
  0x65   :  { %v4298_v22 = vsub.s32 0, %v4295_v21  ;;  %v4306_v24 = vsub.s32 1, %v4295_v21  ;;  %v4331_v43 = vsub.s32 3, %v4295_v21  ;;  %v3577_v47 = vld [vmem:[%s5248_s3 + $0x248] ss:$16 sps:$4 sm:$0xff]  }
  0x66   :  { %v3582_v49 = vld [vmem:[%s5248_s3 + $0x264] ss:$16 sps:$4 sm:$0xff]   ;;  %v3585_v50 = vld [vmem:[%s5248_s3 + $0x26c] ss:$16 sps:$4 sm:$0xff]   ;;  %v3580_v53 = vld [vmem:[%s5248_s3 + $0x260] ss:$16 sps:$4 sm:$0xff]  }
  0x67   :  { %v50_v25 = vrot.slane %v4303_v23, %v4298_v22  ;;  %v54_v26 = vrot.slane %v4303_v23, %v4306_v24  ;;  %v62_v48 = vrot.slane %v4303_v23, %v4331_v43  ;;  %v3583_v54 = vld [vmem:[%s5248_s3 + $0x268] ss:$16 sps:$4 sm:$0xff]   ;;  %v3588_v57 = vld [vmem:[%s5248_s3 + $0x284] ss:$16 sps:$4 sm:$0xff]   ;;  %v3591_v58 = vld [vmem:[%s5248_s3 + $0x28c] ss:$16 sps:$4 sm:$0xff]  }
  0x68   :  { %v3586_v61 = vld [vmem:[%s5248_s3 + $0x280] ss:$16 sps:$4 sm:$0xff]   ;;  %v3589_v62 = vld [vmem:[%s5248_s3 + $0x288] ss:$16 sps:$4 sm:$0xff]   ;;  %v3594_v0 = vld [vmem:[%s5248_s3 + $0x2a4] ss:$16 sps:$4 sm:$0xff]  }
  0x69   :  { %v3597_v1 = vld [vmem:[%s5248_s3 + $0x2ac] ss:$16 sps:$4 sm:$0xff]   ;;  %v3592_v2 = vld [vmem:[%s5248_s3 + $0x2a0] ss:$16 sps:$4 sm:$0xff]   ;;  %v3595_v3 = vld [vmem:[%s5248_s3 + $0x2a8] ss:$16 sps:$4 sm:$0xff]  }
  0x6a   :  { %v3600_v4 = vld [vmem:[%s5248_s3 + $0x2c4] ss:$16 sps:$4 sm:$0xff]   ;;  %v3603_v5 = vld [vmem:[%s5248_s3 + $0x2cc] ss:$16 sps:$4 sm:$0xff]   ;;  %v3598_v6 = vld [vmem:[%s5248_s3 + $0x2c0] ss:$16 sps:$4 sm:$0xff]  }
  0x6b   :  { %v3601_v7 = vld [vmem:[%s5248_s3 + $0x2c8] ss:$16 sps:$4 sm:$0xff]   ;;  %v3606_v8 = vld [vmem:[%s5248_s3 + $0x2e4] ss:$16 sps:$4 sm:$0xff]   ;;  %v3609_v9 = vld [vmem:[%s5248_s3 + $0x2ec] ss:$16 sps:$4 sm:$0xff]  }
  0x6c   :  { %v3604_v10 = vld [vmem:[%s5248_s3 + $0x2e0] ss:$16 sps:$4 sm:$0xff]   ;;  %v3607_v11 = vld [vmem:[%s5248_s3 + $0x2e8] ss:$16 sps:$4 sm:$0xff]   ;;  %v3612_v12 = vld [vmem:[%s5248_s3 + $0x304] ss:$16 sps:$4 sm:$0xff]  }
  0x6d   :  { %v3615_v13 = vld [vmem:[%s5248_s3 + $0x30c] ss:$16 sps:$4 sm:$0xff]   ;;  %v3610_v14 = vld [vmem:[%s5248_s3 + $0x300] ss:$16 sps:$4 sm:$0xff]   ;;  %v3613_v15 = vld [vmem:[%s5248_s3 + $0x308] ss:$16 sps:$4 sm:$0xff]  }
  0x6e   :  { %v3618_v16 = vld [vmem:[%s5248_s3 + $0x324] ss:$16 sps:$4 sm:$0xff]   ;;  %v3621_v17 = vld [vmem:[%s5248_s3 + $0x32c] ss:$16 sps:$4 sm:$0xff]   ;;  %v3616_v18 = vld [vmem:[%s5248_s3 + $0x320] ss:$16 sps:$4 sm:$0xff]  }
  0x6f   :  { %v3619_v19 = vld [vmem:[%s5248_s3 + $0x328] ss:$16 sps:$4 sm:$0xff]   ;;  %v3624_v20 = vld [vmem:[%s5248_s3 + $0x344] ss:$16 sps:$4 sm:$0xff]  }
  0xe5   :  { %v185_v27 = vpop.f32.mrb[0].mxu1 }
  0xe6   :  { %v186_v28 = vadd.f32 %v185_v27, %v50_v25  ;;  %v187_v29 = vpop.f32.mrb[1].mxu1  ;;  %v3627_v25 = vld [vmem:[%s5248_s3 + $0x34c] ss:$16 sps:$4 sm:$0xff]   ;;  %v3625_v27 = vld [vmem:[%s5248_s3 + $0x348] ss:$16 sps:$4 sm:$0xff]  }
  0xe7   :  { %v188_v30 = vadd.f32 %v187_v29, %v54_v26  ;;  %v189_v31 = vpop.f32.mrb[2].mxu1  ;;  %v3622_v26 = vld [vmem:[%s5248_s3 + $0x340] ss:$16 sps:$4 sm:$0xff]   ;;  %v3633_v29 = vld [vmem:[%s5248_s3 + $0x36c] ss:$16 sps:$4 sm:$0xff]  }
  0xe8   :  { %v233_v32 = vmax.f32 %v186_v28, 0.0  ;;  %v190_v33 = vpop.f32.mrb[3].mxu1  ;;  %v3630_v28 = vld [vmem:[%s5248_s3 + $0x364] ss:$16 sps:$4 sm:$0xff]   ;;  %v3631_v31 = vld [vmem:[%s5248_s3 + $0x368] ss:$16 sps:$4 sm:$0xff]  }
  0xe9   :  { %v234_v34 = vmax.f32 %v188_v30, 0.0  ;;  %v3628_v30 = vld [vmem:[%s5248_s3 + $0x360] ss:$16 sps:$4 sm:$0xff]   ;;  %v3639_v33 = vld [vmem:[%s5248_s3 + $0x38c] ss:$16 sps:$4 sm:$0xff]  }
  0xea   :  { %v237_v38 = vpack.c.bf16 %v233_v32, %v233_v32  ;;  %v3636_v32 = vld [vmem:[%s5248_s3 + $0x384] ss:$16 sps:$4 sm:$0xff]  }
  0xeb   :  { %v238_v35 = vpack.c.bf16 %v234_v34, %v234_v34  ;;  %v3634_v34 = vld [vmem:[%s5248_s3 + $0x380] ss:$16 sps:$4 sm:$0xff]  }
  0xed   :  { %1063 = vmatprep.mubr.bf16.mxu0 %v238_v35  ;;  %1145 = vmatprep.mubr.bf16.mxu1 %v238_v35  ;;  %v3637_v35 = vld [vmem:[%s5248_s3 + $0x388] ss:$16 sps:$4 sm:$0xff]  }
  0xee   :  { %1064 = vmatmul.mubr.bf16.vlgmr.msra.gmra.mrb[0].mxu0 %v237_v38  ;;  %1146 = vmatmul.mubr.bf16.vlgmr.msra.gmra.mrb[8].mxu1 %v237_v38  ;;  %v3645_v38 = vld [vmem:[%s5248_s3 + $0x3ac] ss:$16 sps:$4 sm:$0xff]  }
  0xef   :  { %1073 = vmatpush1.bf16.msra.mxu0 %v3562_v36  ;;  %1155 = vmatpush1.bf16.msra.mxu1 %v3565_v37  ;;  %v4470_v36 = vsub.s32 2, %v4295_v21  ;;  %v3642_v37 = vld [vmem:[%s5248_s3 + $0x3a4] ss:$16 sps:$4 sm:$0xff]  }
  0xf0   :  { %1074 = vmatprep.subr.bf16.mxu0 %v3570_v39  ;;  %1156 = vmatprep.subr.bf16.mxu1 %v3573_v40  ;;  %v3640_v39 = vld [vmem:[%s5248_s3 + $0x3a0] ss:$16 sps:$4 sm:$0xff]   ;;  %v3643_v40 = vld [vmem:[%s5248_s3 + $0x3a8] ss:$16 sps:$4 sm:$0xff]  }
  0xf3   :  { %1075 = vmatpush1.bf16.msra.mxu0 %v3568_v41  ;;  %1157 = vmatpush1.bf16.msra.mxu1 %v3571_v42  ;;  %v58_v41 = vrot.slane %v4303_v23, %v4470_v36  ;;  %v3648_v42 = vld [vmem:[%s5248_s3 + $0x3c4] ss:$16 sps:$4 sm:$0xff]   ;;  %v3649_v23 = vld [vmem:[%s5248_s3 + $0x3c8] ss:$16 sps:$4 sm:$0xff]  }
  0xf4   :  { %1076 = vmatprep.subr.bf16.mxu0 %v3576_v44  ;;  %1158 = vmatprep.subr.bf16.mxu1 %v3579_v45  ;;  %v3651_v44 = vld [vmem:[%s5248_s3 + $0x3cc] ss:$16 sps:$4 sm:$0xff]   ;;  %v3646_v45 = vld [vmem:[%s5248_s3 + $0x3c0] ss:$16 sps:$4 sm:$0xff]  }
  0xf5   :  { %v4353_v51 = vpop.f32.mrb[4].mxu1 }
  0xf6   :  { %v228_v52 = vpop.f32.mrb[5].mxu1 }
  0xf7   :  { %1077 = vmatpush1.bf16.msra.mxu0 %v3574_v46  ;;  %1159 = vmatpush1.bf16.msra.mxu1 %v3577_v47  ;;  %v229_v55 = vadd.f32 %v228_v52, %v62_v48  ;;  %v230_v56 = vpop.f32.mrb[6].mxu1  ;;  %v227_v46 = vadd.f32 %v4353_v51, %v58_v41  ;;  %v3654_v47 = vld [vmem:[%s5248_s3 + $0x3e4] ss:$16 sps:$4 sm:$0xff]   ;;  %v3657_v48 = vld [vmem:[%s5248_s3 + $0x3ec] ss:$16 sps:$4 sm:$0xff]  }
  0xf8   :  { %1078 = vmatprep.subr.bf16.mxu0 %v3582_v49  ;;  %1160 = vmatprep.subr.bf16.mxu1 %v3585_v50  ;;  %v231_v59 = vpop.f32.mrb[7].mxu1  ;;  %v3652_v49 = vld [vmem:[%s5248_s3 + $0x3e0] ss:$16 sps:$4 sm:$0xff]   ;;  %v3655_v50 = vld [vmem:[%s5248_s3 + $0x3e8] ss:$16 sps:$4 sm:$0xff]  }
  0xf9   :  { %v236_v60 = vmax.f32 %v229_v55, 0.0  ;;  %v235_v51 = vmax.f32 %v227_v46, 0.0  ;;  %v3660_v52 = vld [vmem:[%s5250_s5 + $0x4] ss:$28 sps:$4 sm:$0xff]   ;;  %v3664_v59 = vld [vmem:[%s5250_s5 + $0x38] ss:$28 sps:$4 sm:$0xff]  }
  0xfa   :  { %v3661_v55 = vld [vmem:[%s5250_s5 + $0x8] ss:$28 sps:$4 sm:$0xff]   ;;  %v3727_v41 = vld [vmem:[%s5250_s5 + $0x270] ss:$28 sps:$4 sm:$0xff]   ;;  %v3738_v46 = vld [vmem:[%s5250_s5 + $0x2dc] ss:$28 sps:$4 sm:$0xff]  }
  0xfb   :  { %1079 = vmatpush1.bf16.msra.mxu0 %v3580_v53  ;;  %1161 = vmatpush1.bf16.msra.mxu1 %v3583_v54  ;;  %v240_v63 = vpack.c.bf16 %v236_v60, %v236_v60  ;;  %v3663_v53 = vld [vmem:[%s5250_s5 + $0xc] ss:$28 sps:$4 sm:$0xff]   ;;  %v3658_v54 = vld [vmem:[%s5250_s5] ss:$28 sps:$4 sm:$0xff]   ;;  %v239_v56 = vpack.c.bf16 %v235_v51, %v235_v51 }
  0xfc   :  { %1080 = vmatprep.subr.bf16.mxu0 %v3588_v57  ;;  %1162 = vmatprep.subr.bf16.mxu1 %v3591_v58  ;;  %v3666_v57 = vld [vmem:[%s5250_s5 + $0x3c] ss:$28 sps:$4 sm:$0xff]   ;;  %v3669_v58 = vld [vmem:[%s5250_s5 + $0x44] ss:$28 sps:$4 sm:$0xff]  }
  0xfd   :  { %1104 = vmatprep.mubr.bf16.mxu0 %v240_v63  ;;  %1186 = vmatprep.mubr.bf16.mxu1 %v240_v63  ;;  %v3667_v60 = vld [vmem:[%s5250_s5 + $0x40] ss:$28 sps:$4 sm:$0xff]   ;;  %v3670_v63 = vld [vmem:[%s5250_s5 + $0x70] ss:$28 sps:$4 sm:$0xff]  }
  0xfe   :  { %v3747_v51 = vld [vmem:[%s5250_s5 + $0x31c] ss:$28 sps:$4 sm:$0xff]  }
  0xff   :  { %1081 = vmatpush1.bf16.msra.mxu0 %v3586_v61  ;;  %1163 = vmatpush1.bf16.msra.mxu1 %v3589_v62  ;;  %v3672_v61 = vld [vmem:[%s5250_s5 + $0x74] ss:$28 sps:$4 sm:$0xff]   ;;  %v3675_v62 = vld [vmem:[%s5250_s5 + $0x7c] ss:$28 sps:$4 sm:$0xff]  }
 0x100   :  { %1082 = vmatprep.subr.bf16.mxu0 %v3594_v0  ;;  %1164 = vmatprep.subr.bf16.mxu1 %v3597_v1  ;;  %v3673_v0 = vld [vmem:[%s5250_s5 + $0x78] ss:$28 sps:$4 sm:$0xff]   ;;  %v3678_v1 = vld [vmem:[%s5250_s5 + $0xac] ss:$28 sps:$4 sm:$0xff]  }
 0x103   :  { %1083 = vmatpush1.bf16.msra.mxu0 %v3592_v2  ;;  %1165 = vmatpush1.bf16.msra.mxu1 %v3595_v3  ;;  %v3681_v2 = vld [vmem:[%s5250_s5 + $0xb4] ss:$28 sps:$4 sm:$0xff]   ;;  %v3676_v3 = vld [vmem:[%s5250_s5 + $0xa8] ss:$28 sps:$4 sm:$0xff]  }
 0x104   :  { %1084 = vmatprep.subr.bf16.mxu0 %v3600_v4  ;;  %1166 = vmatprep.subr.bf16.mxu1 %v3603_v5  ;;  %v3679_v4 = vld [vmem:[%s5250_s5 + $0xb0] ss:$28 sps:$4 sm:$0xff]   ;;  %v3684_v5 = vld [vmem:[%s5250_s5 + $0xe4] ss:$28 sps:$4 sm:$0xff]  }
 0x107   :  { %1085 = vmatpush1.bf16.msra.mxu0 %v3598_v6  ;;  %1167 = vmatpush1.bf16.msra.mxu1 %v3601_v7  ;;  %v3687_v6 = vld [vmem:[%s5250_s5 + $0xec] ss:$28 sps:$4 sm:$0xff]   ;;  %v3682_v7 = vld [vmem:[%s5250_s5 + $0xe0] ss:$28 sps:$4 sm:$0xff]  }
 0x108   :  { %1086 = vmatprep.subr.bf16.mxu0 %v3606_v8  ;;  %1168 = vmatprep.subr.bf16.mxu1 %v3609_v9  ;;  %v3685_v8 = vld [vmem:[%s5250_s5 + $0xe8] ss:$28 sps:$4 sm:$0xff]   ;;  %v3690_v9 = vld [vmem:[%s5250_s5 + $0x11c] ss:$28 sps:$4 sm:$0xff]  }
 0x10b   :  { %1087 = vmatpush1.bf16.msra.mxu0 %v3604_v10  ;;  %1169 = vmatpush1.bf16.msra.mxu1 %v3607_v11  ;;  %v3693_v10 = vld [vmem:[%s5250_s5 + $0x124] ss:$28 sps:$4 sm:$0xff]   ;;  %v3688_v11 = vld [vmem:[%s5250_s5 + $0x118] ss:$28 sps:$4 sm:$0xff]  }
 0x10c   :  { %1088 = vmatprep.subr.bf16.mxu0 %v3612_v12  ;;  %1170 = vmatprep.subr.bf16.mxu1 %v3615_v13  ;;  %v3691_v12 = vld [vmem:[%s5250_s5 + $0x120] ss:$28 sps:$4 sm:$0xff]   ;;  %v3696_v13 = vld [vmem:[%s5250_s5 + $0x154] ss:$28 sps:$4 sm:$0xff]  }
 0x10f   :  { %1089 = vmatpush1.bf16.msra.mxu0 %v3610_v14  ;;  %1171 = vmatpush1.bf16.msra.mxu1 %v3613_v15  ;;  %v3699_v14 = vld [vmem:[%s5250_s5 + $0x15c] ss:$28 sps:$4 sm:$0xff]   ;;  %v3694_v15 = vld [vmem:[%s5250_s5 + $0x150] ss:$28 sps:$4 sm:$0xff]  }
 0x110   :  { %1090 = vmatprep.subr.bf16.mxu0 %v3618_v16  ;;  %1172 = vmatprep.subr.bf16.mxu1 %v3621_v17  ;;  %v3697_v16 = vld [vmem:[%s5250_s5 + $0x158] ss:$28 sps:$4 sm:$0xff]   ;;  %v3702_v17 = vld [vmem:[%s5250_s5 + $0x18c] ss:$28 sps:$4 sm:$0xff]  }
 0x113   :  { %1091 = vmatpush1.bf16.msra.mxu0 %v3616_v18  ;;  %1173 = vmatpush1.bf16.msra.mxu1 %v3619_v19  ;;  %v3705_v18 = vld [vmem:[%s5250_s5 + $0x194] ss:$28 sps:$4 sm:$0xff]   ;;  %v3700_v19 = vld [vmem:[%s5250_s5 + $0x188] ss:$28 sps:$4 sm:$0xff]  }
 0x114   :  { %1092 = vmatprep.subr.bf16.mxu0 %v3624_v20  ;;  %1174 = vmatprep.subr.bf16.mxu1 %v3627_v25  ;;  %v3703_v20 = vld [vmem:[%s5250_s5 + $0x190] ss:$28 sps:$4 sm:$0xff]   ;;  %v3708_v25 = vld [vmem:[%s5250_s5 + $0x1c4] ss:$28 sps:$4 sm:$0xff]  }
 0x117   :  { %1093 = vmatpush1.bf16.msra.mxu0 %v3622_v26  ;;  %1175 = vmatpush1.bf16.msra.mxu1 %v3625_v27  ;;  %v3711_v26 = vld [vmem:[%s5250_s5 + $0x1cc] ss:$28 sps:$4 sm:$0xff]   ;;  %v3706_v27 = vld [vmem:[%s5250_s5 + $0x1c0] ss:$28 sps:$4 sm:$0xff]  }
 0x118   :  { %1094 = vmatprep.subr.bf16.mxu0 %v3630_v28  ;;  %1176 = vmatprep.subr.bf16.mxu1 %v3633_v29  ;;  %v3709_v28 = vld [vmem:[%s5250_s5 + $0x1c8] ss:$28 sps:$4 sm:$0xff]   ;;  %v3714_v29 = vld [vmem:[%s5250_s5 + $0x1fc] ss:$28 sps:$4 sm:$0xff]  }
 0x11b   :  { %1095 = vmatpush1.bf16.msra.mxu0 %v3628_v30  ;;  %1177 = vmatpush1.bf16.msra.mxu1 %v3631_v31  ;;  %v3717_v30 = vld [vmem:[%s5250_s5 + $0x204] ss:$28 sps:$4 sm:$0xff]   ;;  %v3712_v31 = vld [vmem:[%s5250_s5 + $0x1f8] ss:$28 sps:$4 sm:$0xff]  }
 0x11c   :  { %1096 = vmatprep.subr.bf16.mxu0 %v3636_v32  ;;  %1178 = vmatprep.subr.bf16.mxu1 %v3639_v33  ;;  %v3715_v32 = vld [vmem:[%s5250_s5 + $0x200] ss:$28 sps:$4 sm:$0xff]   ;;  %v3720_v33 = vld [vmem:[%s5250_s5 + $0x234] ss:$28 sps:$4 sm:$0xff]  }
 0x11f   :  { %1097 = vmatpush1.bf16.msra.mxu0 %v3634_v34  ;;  %1179 = vmatpush1.bf16.msra.mxu1 %v3637_v35  ;;  %v3723_v34 = vld [vmem:[%s5250_s5 + $0x23c] ss:$28 sps:$4 sm:$0xff]   ;;  %v3718_v35 = vld [vmem:[%s5250_s5 + $0x230] ss:$28 sps:$4 sm:$0xff]  }
 0x120   :  { %1098 = vmatprep.subr.bf16.mxu0 %v3642_v37  ;;  %1180 = vmatprep.subr.bf16.mxu1 %v3645_v38  ;;  %v3721_v37 = vld [vmem:[%s5250_s5 + $0x238] ss:$28 sps:$4 sm:$0xff]   ;;  %v3726_v38 = vld [vmem:[%s5250_s5 + $0x26c] ss:$28 sps:$4 sm:$0xff]  }
 0x123   :  { %1099 = vmatpush1.bf16.msra.mxu0 %v3640_v39  ;;  %1181 = vmatpush1.bf16.msra.mxu1 %v3643_v40  ;;  %v3729_v39 = vld [vmem:[%s5250_s5 + $0x274] ss:$28 sps:$4 sm:$0xff]   ;;  %v3724_v40 = vld [vmem:[%s5250_s5 + $0x268] ss:$28 sps:$4 sm:$0xff]  }
 0x124   :  { %1100 = vmatprep.subr.bf16.mxu0 %v3648_v42  ;;  %1182 = vmatprep.subr.bf16.mxu1 %v3651_v44  ;;  %v3732_v42 = vld [vmem:[%s5250_s5 + $0x2a4] ss:$28 sps:$4 sm:$0xff]   ;;  %v3735_v44 = vld [vmem:[%s5250_s5 + $0x2ac] ss:$28 sps:$4 sm:$0xff]  }
 0x127   :  { %1101 = vmatpush1.bf16.msra.mxu0 %v3646_v45  ;;  %1183 = vmatpush1.bf16.msra.mxu1 %v3649_v23  ;;  %v3730_v45 = vld [vmem:[%s5250_s5 + $0x2a0] ss:$28 sps:$4 sm:$0xff]   ;;  %v3733_v23 = vld [vmem:[%s5250_s5 + $0x2a8] ss:$28 sps:$4 sm:$0xff]  }
 0x128   :  { %1102 = vmatprep.subr.bf16.mxu0 %v3654_v47  ;;  %1184 = vmatprep.subr.bf16.mxu1 %v3657_v48  ;;  %v3741_v47 = vld [vmem:[%s5250_s5 + $0x2e4] ss:$28 sps:$4 sm:$0xff]   ;;  %v3736_v48 = vld [vmem:[%s5250_s5 + $0x2d8] ss:$28 sps:$4 sm:$0xff]  }
 0x12b   :  { %1103 = vmatpush1.bf16.msra.mxu0 %v3652_v49  ;;  %1185 = vmatpush1.bf16.msra.mxu1 %v3655_v50  ;;  %v3739_v49 = vld [vmem:[%s5250_s5 + $0x2e0] ss:$28 sps:$4 sm:$0xff]   ;;  %v3744_v50 = vld [vmem:[%s5250_s5 + $0x314] ss:$28 sps:$4 sm:$0xff]  }
 0x12c   :  { %2648 = vmatprep.subr.bf16.mxu0 %v3660_v52  ;;  %2730 = vmatprep.subr.bf16.mxu1 %v3663_v53  ;;  %v3742_v52 = vld [vmem:[%s5250_s5 + $0x310] ss:$28 sps:$4 sm:$0xff]   ;;  %v3745_v53 = vld [vmem:[%s5250_s5 + $0x318] ss:$28 sps:$4 sm:$0xff]  }
 0x12e   :  { %1105 = vmatmul.mubr.bf16.vlgmr.msra.gmra.mrb[0].mxu0 %v239_v56  ;;  %1187 = vmatmul.mubr.bf16.vlgmr.msra.gmra.mrb[8].mxu1 %v239_v56  ;;  %v3748_v56 = vld [vmem:[%s5250_s5 + $0x348] ss:$28 sps:$4 sm:$0xff]  }
 0x12f   :  { %2649 = vmatpush1.bf16.msra.mxu0 %v3658_v54  ;;  %2731 = vmatpush1.bf16.msra.mxu1 %v3661_v55  ;;  %v3750_v54 = vld [vmem:[%s5250_s5 + $0x34c] ss:$28 sps:$4 sm:$0xff]   ;;  %v3753_v55 = vld [vmem:[%s5250_s5 + $0x354] ss:$28 sps:$4 sm:$0xff]  }
 0x130   :  { %2650 = vmatprep.subr.bf16.mxu0 %v3666_v57  ;;  %2732 = vmatprep.subr.bf16.mxu1 %v3669_v58  ;;  %v3751_v57 = vld [vmem:[%s5250_s5 + $0x350] ss:$28 sps:$4 sm:$0xff]   ;;  %v3756_v58 = vld [vmem:[%s5250_s5 + $0x384] ss:$28 sps:$4 sm:$0xff]  }
 0x133   :  { %2651 = vmatpush1.bf16.msra.mxu0 %v3664_v59  ;;  %2733 = vmatpush1.bf16.msra.mxu1 %v3667_v60  ;;  %v3759_v59 = vld [vmem:[%s5250_s5 + $0x38c] ss:$28 sps:$4 sm:$0xff]   ;;  %v4712_v60 = vld [vmem:[%s5249_s4] sm:$0xf] }
 0x134   :  { %2652 = vmatprep.subr.bf16.mxu0 %v3672_v61  ;;  %2734 = vmatprep.subr.bf16.mxu1 %v3675_v62  ;;  %v374_v61 = vrot.slane %v4712_v60, %v4298_v22  ;;  %v378_v62 = vrot.slane %v4712_v60, %v4306_v24 }
 0x137   :  { %2653 = vmatpush1.bf16.msra.mxu0 %v3670_v63  ;;  %2735 = vmatpush1.bf16.msra.mxu1 %v3673_v0  ;;  %v386_v63 = vrot.slane %v4712_v60, %v4331_v43 }
 0x138   :  { %2654 = vmatprep.subr.bf16.mxu0 %v3678_v1  ;;  %2736 = vmatprep.subr.bf16.mxu1 %v3681_v2 }
 0x13b   :  { %2655 = vmatpush1.bf16.msra.mxu0 %v3676_v3  ;;  %2737 = vmatpush1.bf16.msra.mxu1 %v3679_v4 }
 0x13c   :  { %2656 = vmatprep.subr.bf16.mxu0 %v3684_v5  ;;  %2738 = vmatprep.subr.bf16.mxu1 %v3687_v6 }
 0x13f   :  { %2657 = vmatpush1.bf16.msra.mxu0 %v3682_v7  ;;  %2739 = vmatpush1.bf16.msra.mxu1 %v3685_v8 }
 0x140   :  { %2658 = vmatprep.subr.bf16.mxu0 %v3690_v9  ;;  %2740 = vmatprep.subr.bf16.mxu1 %v3693_v10 }
 0x143   :  { %2659 = vmatpush1.bf16.msra.mxu0 %v3688_v11  ;;  %2741 = vmatpush1.bf16.msra.mxu1 %v3691_v12 }
 0x144   :  { %2660 = vmatprep.subr.bf16.mxu0 %v3696_v13  ;;  %2742 = vmatprep.subr.bf16.mxu1 %v3699_v14 }
 0x147   :  { %2661 = vmatpush1.bf16.msra.mxu0 %v3694_v15  ;;  %2743 = vmatpush1.bf16.msra.mxu1 %v3697_v16  ;;  %v3754_v15 = vld [vmem:[%s5250_s5 + $0x380] ss:$28 sps:$4 sm:$0xff]   ;;  %v3757_v16 = vld [vmem:[%s5250_s5 + $0x388] ss:$28 sps:$4 sm:$0xff]  }
 0x148   :  { %2662 = vmatprep.subr.bf16.mxu0 %v3702_v17  ;;  %2744 = vmatprep.subr.bf16.mxu1 %v3705_v18  ;;  %v3762_v18 = vld [vmem:[%s5250_s5 + $0x3bc] ss:$28 sps:$4 sm:$0xff]  }
 0x14b   :  { %2663 = vmatpush1.bf16.msra.mxu0 %v3700_v19  ;;  %2745 = vmatpush1.bf16.msra.mxu1 %v3703_v20  ;;  %v3765_v19 = vld [vmem:[%s5250_s5 + $0x3c4] ss:$28 sps:$4 sm:$0xff]  }
 0x14c   :  { %2664 = vmatprep.subr.bf16.mxu0 %v3708_v25  ;;  %2746 = vmatprep.subr.bf16.mxu1 %v3711_v26  ;;  %v3760_v25 = vld [vmem:[%s5250_s5 + $0x3b8] ss:$28 sps:$4 sm:$0xff]   ;;  %v3763_v26 = vld [vmem:[%s5250_s5 + $0x3c0] ss:$28 sps:$4 sm:$0xff]  }
 0x14f   :  { %2665 = vmatpush1.bf16.msra.mxu0 %v3706_v27  ;;  %2747 = vmatpush1.bf16.msra.mxu1 %v3709_v28  ;;  %v3768_v27 = vld [vmem:[%s5250_s5 + $0x3f4] ss:$28 sps:$4 sm:$0xff]   ;;  %v3771_v28 = vld [vmem:[%s5250_s5 + $0x3fc] ss:$28 sps:$4 sm:$0xff]  }
 0x150   :  { %2666 = vmatprep.subr.bf16.mxu0 %v3714_v29  ;;  %2748 = vmatprep.subr.bf16.mxu1 %v3717_v30  ;;  %v3766_v29 = vld [vmem:[%s5250_s5 + $0x3f0] ss:$28 sps:$4 sm:$0xff]   ;;  %v3769_v30 = vld [vmem:[%s5250_s5 + $0x3f8] ss:$28 sps:$4 sm:$0xff]  }
 0x153   :  { %2667 = vmatpush1.bf16.msra.mxu0 %v3712_v31  ;;  %2749 = vmatpush1.bf16.msra.mxu1 %v3715_v32  ;;  %v3774_v31 = vld [vmem:[%s5250_s5 + $0x42c] ss:$28 sps:$4 sm:$0xff]   ;;  %v3777_v32 = vld [vmem:[%s5250_s5 + $0x434] ss:$28 sps:$4 sm:$0xff]  }
 0x154   :  { %2668 = vmatprep.subr.bf16.mxu0 %v3720_v33  ;;  %2750 = vmatprep.subr.bf16.mxu1 %v3723_v34  ;;  %v3772_v33 = vld [vmem:[%s5250_s5 + $0x428] ss:$28 sps:$4 sm:$0xff]   ;;  %v3775_v34 = vld [vmem:[%s5250_s5 + $0x430] ss:$28 sps:$4 sm:$0xff]  }
 0x157   :  { %2669 = vmatpush1.bf16.msra.mxu0 %v3718_v35  ;;  %2751 = vmatpush1.bf16.msra.mxu1 %v3721_v37  ;;  %v3780_v35 = vld [vmem:[%s5250_s5 + $0x464] ss:$28 sps:$4 sm:$0xff]   ;;  %v3783_v37 = vld [vmem:[%s5250_s5 + $0x46c] ss:$28 sps:$4 sm:$0xff]  }
 0x158   :  { %2670 = vmatprep.subr.bf16.mxu0 %v3726_v38  ;;  %2752 = vmatprep.subr.bf16.mxu1 %v3729_v39  ;;  %v3778_v38 = vld [vmem:[%s5250_s5 + $0x460] ss:$28 sps:$4 sm:$0xff]   ;;  %v3781_v39 = vld [vmem:[%s5250_s5 + $0x468] ss:$28 sps:$4 sm:$0xff]  }
 0x15b   :  { %2671 = vmatpush1.bf16.msra.mxu0 %v3724_v40  ;;  %2753 = vmatpush1.bf16.msra.mxu1 %v3727_v41  ;;  %v3786_v40 = vld [vmem:[%s5250_s5 + $0x49c] ss:$28 sps:$4 sm:$0xff]   ;;  %v3789_v41 = vld [vmem:[%s5250_s5 + $0x4a4] ss:$28 sps:$4 sm:$0xff]  }
 0x15c   :  { %2672 = vmatprep.subr.bf16.mxu0 %v3732_v42  ;;  %2754 = vmatprep.subr.bf16.mxu1 %v3735_v44  ;;  %v3784_v42 = vld [vmem:[%s5250_s5 + $0x498] ss:$28 sps:$4 sm:$0xff]   ;;  %v3787_v44 = vld [vmem:[%s5250_s5 + $0x4a0] ss:$28 sps:$4 sm:$0xff]  }
 0x15f   :  { %2673 = vmatpush1.bf16.msra.mxu0 %v3730_v45  ;;  %2755 = vmatpush1.bf16.msra.mxu1 %v3733_v23  ;;  %v3792_v45 = vld [vmem:[%s5250_s5 + $0x4d4] ss:$28 sps:$4 sm:$0xff]   ;;  %v3795_v23 = vld [vmem:[%s5250_s5 + $0x4dc] ss:$28 sps:$4 sm:$0xff]  }
 0x160   :  { %2674 = vmatprep.subr.bf16.mxu0 %v3738_v46  ;;  %2756 = vmatprep.subr.bf16.mxu1 %v3741_v47  ;;  %v3790_v46 = vld [vmem:[%s5250_s5 + $0x4d0] ss:$28 sps:$4 sm:$0xff]   ;;  %v3793_v47 = vld [vmem:[%s5250_s5 + $0x4d8] ss:$28 sps:$4 sm:$0xff]  }
 0x163   :  { %2675 = vmatpush1.bf16.msra.mxu0 %v3736_v48  ;;  %2757 = vmatpush1.bf16.msra.mxu1 %v3739_v49  ;;  %v3798_v48 = vld [vmem:[%s5250_s5 + $0x50c] ss:$28 sps:$4 sm:$0xff]   ;;  %v3801_v49 = vld [vmem:[%s5250_s5 + $0x514] ss:$28 sps:$4 sm:$0xff]  }
 0x164   :  { %2676 = vmatprep.subr.bf16.mxu0 %v3744_v50  ;;  %2758 = vmatprep.subr.bf16.mxu1 %v3747_v51  ;;  %v3796_v50 = vld [vmem:[%s5250_s5 + $0x508] ss:$28 sps:$4 sm:$0xff]   ;;  %v3799_v51 = vld [vmem:[%s5250_s5 + $0x510] ss:$28 sps:$4 sm:$0xff]  }
 0x167   :  { %2677 = vmatpush1.bf16.msra.mxu0 %v3742_v52  ;;  %2759 = vmatpush1.bf16.msra.mxu1 %v3745_v53  ;;  %v3804_v52 = vld [vmem:[%s5250_s5 + $0x544] ss:$28 sps:$4 sm:$0xff]   ;;  %v3807_v53 = vld [vmem:[%s5250_s5 + $0x54c] ss:$28 sps:$4 sm:$0xff]  }
 0x168   :  { %2678 = vmatprep.subr.bf16.mxu0 %v3750_v54  ;;  %2760 = vmatprep.subr.bf16.mxu1 %v3753_v55  ;;  %v3802_v54 = vld [vmem:[%s5250_s5 + $0x540] ss:$28 sps:$4 sm:$0xff]   ;;  %v3805_v55 = vld [vmem:[%s5250_s5 + $0x548] ss:$28 sps:$4 sm:$0xff]  }
 0x16b   :  { %2679 = vmatpush1.bf16.msra.mxu0 %v3748_v56  ;;  %2761 = vmatpush1.bf16.msra.mxu1 %v3751_v57  ;;  %v3810_v56 = vld [vmem:[%s5250_s5 + $0x57c] ss:$28 sps:$4 sm:$0xff]   ;;  %v3813_v57 = vld [vmem:[%s5250_s5 + $0x584] ss:$28 sps:$4 sm:$0xff]  }
 0x16c   :  { %2689 = vmatprep.subr.bf16.mxu0 %v3756_v58  ;;  %2771 = vmatprep.subr.bf16.mxu1 %v3759_v59  ;;  %v3808_v58 = vld [vmem:[%s5250_s5 + $0x578] ss:$28 sps:$4 sm:$0xff]   ;;  %v3811_v59 = vld [vmem:[%s5250_s5 + $0x580] ss:$28 sps:$4 sm:$0xff]  }
 0x201   :  { %v1106_v0 = vpop.f32.mrb[0].mxu0  ;;  %v4720_v1 = vpop.f32.mrb[8].mxu1 }
 0x202   :  { %v3410_v2 = vadd.f32 %v1106_v0, %v374_v61  ;;  %v1108_v3 = vpop.f32.mrb[1].mxu0  ;;  %v1190_v4 = vpop.f32.mrb[9].mxu1  ;;  %v3816_v61 = vld [vmem:[%s5250_s5 + $0x5b4] ss:$28 sps:$4 sm:$0xff]  }
 0x203   :  { %v3411_v5 = vadd.f32 %v1108_v3, %v378_v62  ;;  %v3413_v6 = vadd.f32 %v1190_v4, %v386_v63  ;;  %v1110_v7 = vpop.f32.mrb[2].mxu0  ;;  %v1192_v8 = vpop.f32.mrb[10].mxu1  ;;  %v3819_v62 = vld [vmem:[%s5250_s5 + $0x5bc] ss:$28 sps:$4 sm:$0xff]   ;;  %v3814_v63 = vld [vmem:[%s5250_s5 + $0x5b0] ss:$28 sps:$4 sm:$0xff]  }
 0x204   :  { %v1195_v9 = vmax.f32 %v3410_v2, 0.0  ;;  %v1111_v10 = vpop.f32.mrb[3].mxu0  ;;  %v1193_v11 = vpop.f32.mrb[11].mxu1  ;;  %v3817_v0 = vld [vmem:[%s5250_s5 + $0x5b8] ss:$28 sps:$4 sm:$0xff]  }
 0x205   :  { %v1196_v12 = vmax.f32 %v3411_v5, 0.0  ;;  %v1198_v13 = vmax.f32 %v3413_v6, 0.0  ;;  %v3822_v2 = vld [vmem:[%s5250_s5 + $0x5ec] ss:$28 sps:$4 sm:$0xff]   ;;  %v3825_v3 = vld [vmem:[%s5250_s5 + $0x5f4] ss:$28 sps:$4 sm:$0xff]  }
 0x206   :  { %v4730_v17 = vpack.c.bf16 %v1195_v9, %v1195_v9  ;;  %v3820_v4 = vld [vmem:[%s5250_s5 + $0x5e8] ss:$28 sps:$4 sm:$0xff]   ;;  %v3823_v5 = vld [vmem:[%s5250_s5 + $0x5f0] ss:$28 sps:$4 sm:$0xff]   ;;  %v3826_v8 = vld [vmem:[%s5250_s5 + $0x620] ss:$28 sps:$4 sm:$0xff]  }
 0x207   :  { %v4722_v14 = vpack.c.bf16 %v1196_v12, %v1196_v12  ;;  %v4740_v20 = vpack.c.bf16 %v1198_v13, %v1198_v13  ;;  %v3828_v6 = vld [vmem:[%s5250_s5 + $0x624] ss:$28 sps:$4 sm:$0xff]   ;;  %v3831_v7 = vld [vmem:[%s5250_s5 + $0x62c] ss:$28 sps:$4 sm:$0xff]   ;;  %v3834_v10 = vld [vmem:[%s5250_s5 + $0x65c] ss:$28 sps:$4 sm:$0xff]  }
 0x208   :  { %v3829_v9 = vld [vmem:[%s5250_s5 + $0x628] ss:$28 sps:$4 sm:$0xff]   ;;  %v3832_v12 = vld [vmem:[%s5250_s5 + $0x658] ss:$28 sps:$4 sm:$0xff]   ;;  %v3835_v13 = vld [vmem:[%s5250_s5 + $0x660] ss:$28 sps:$4 sm:$0xff]  }
 0x209   :  { %2680 = vmatprep.mubr.bf16.mxu0 %v4722_v14  ;;  %2762 = vmatprep.mubr.bf16.mxu1 %v4722_v14  ;;  %v3837_v11 = vld [vmem:[%s5250_s5 + $0x664] ss:$28 sps:$4 sm:$0xff]  }
 0x20a   :  { %2681 = vmatmul.mubr.bf16.vlgmr.msra.gmra.mrb[4].mxu0 %v4730_v17  ;;  %2763 = vmatmul.mubr.bf16.vlgmr.msra.gmra.mrb[12].mxu1 %v4730_v17 }
 0x20b   :  { %2690 = vmatpush1.bf16.msra.mxu0 %v3754_v15  ;;  %2772 = vmatpush1.bf16.msra.mxu1 %v3757_v16  ;;  %v382_v15 = vrot.slane %v4712_v60, %v4470_v36  ;;  %v3840_v16 = vld [vmem:[%s5250_s5 + $0x694] ss:$28 sps:$4 sm:$0xff]  }
 0x20c   :  { %2721 = vmatprep.mubr.bf16.mxu0 %v4740_v20  ;;  %2803 = vmatprep.mubr.bf16.mxu1 %v4740_v20  ;;  %v3841_v60 = vld [vmem:[%s5250_s5 + $0x698] ss:$28 sps:$4 sm:$0xff]  }
 0x20d   :  { %2691 = vmatprep.subr.bf16.mxu0 %v3762_v18  ;;  %2773 = vmatprep.subr.bf16.mxu1 %v3765_v19  ;;  %v3843_v18 = vld [vmem:[%s5250_s5 + $0x69c] ss:$28 sps:$4 sm:$0xff]   ;;  %v3838_v19 = vld [vmem:[%s5250_s5 + $0x690] ss:$28 sps:$4 sm:$0xff]  }
 0x20f   :  { %2692 = vmatpush1.bf16.msra.mxu0 %v3760_v25  ;;  %2774 = vmatpush1.bf16.msra.mxu1 %v3763_v26  ;;  %v3412_v25 = vadd.f32 %v4720_v1, %v382_v15  ;;  %v3846_v26 = vld [vmem:[%s5250_s5 + $0x6cc] ss:$28 sps:$4 sm:$0xff]   ;;  %v3908_v15 = vld [vmem:[%s5250_s5 + $0x600] ss:$28 sps:$4 sm:$0xff]  }
 0x210   :  { %2693 = vmatprep.subr.bf16.mxu0 %v3768_v27  ;;  %2775 = vmatprep.subr.bf16.mxu1 %v3771_v28  ;;  %v3849_v27 = vld [vmem:[%s5250_s5 + $0x6d4] ss:$28 sps:$4 sm:$0xff]   ;;  %v3844_v28 = vld [vmem:[%s5250_s5 + $0x6c8] ss:$28 sps:$4 sm:$0xff]  }
 0x211   :  { %v3847_v1 = vld [vmem:[%s5250_s5 + $0x6d0] ss:$28 sps:$4 sm:$0xff]  }
 0x213   :  { %2694 = vmatpush1.bf16.msra.mxu0 %v3766_v29  ;;  %2776 = vmatpush1.bf16.msra.mxu1 %v3769_v30  ;;  %v1197_v29 = vmax.f32 %v3412_v25, 0.0  ;;  %v3852_v30 = vld [vmem:[%s5250_s5 + $0x14] ss:$28 sps:$4 sm:$0xff]  }
 0x214   :  { %2695 = vmatprep.subr.bf16.mxu0 %v3774_v31  ;;  %2777 = vmatprep.subr.bf16.mxu1 %v3777_v32  ;;  %v3853_v31 = vld [vmem:[%s5250_s5 + $0x1d8] ss:$28 sps:$4 sm:$0xff]   ;;  %v3850_v32 = vld [vmem:[%s5250_s5 + $0x10] ss:$28 sps:$4 sm:$0xff]  }
 0x215   :  { %v3910_v25 = vld [vmem:[%s5250_s5 + $0x2b0] ss:$28 sps:$4 sm:$0xff]  }
 0x217   :  { %2696 = vmatpush1.bf16.msra.mxu0 %v3772_v33  ;;  %2778 = vmatpush1.bf16.msra.mxu1 %v3775_v34  ;;  %v4932_v33 = vpack.c.bf16 %v1197_v29, %v1197_v29  ;;  %v3854_v34 = vld [vmem:[%s5250_s5 + $0x18] ss:$28 sps:$4 sm:$0xff]   ;;  %v3919_v29 = vld [vmem:[%s5250_s5 + $0x4b0] ss:$28 sps:$4 sm:$0xff]  }
 0x218   :  { %2697 = vmatprep.subr.bf16.mxu0 %v3780_v35  ;;  %2779 = vmatprep.subr.bf16.mxu1 %v3783_v37  ;;  %v3857_v35 = vld [vmem:[%s5250_s5 + $0x4c] ss:$28 sps:$4 sm:$0xff]  }
 0x219   :  { %v3858_v37 = vld [vmem:[%s5250_s5 + $0x210] ss:$28 sps:$4 sm:$0xff]  }
 0x21b   :  { %2698 = vmatpush1.bf16.msra.mxu0 %v3778_v38  ;;  %2780 = vmatpush1.bf16.msra.mxu1 %v3781_v39  ;;  %v3855_v38 = vld [vmem:[%s5250_s5 + $0x48] ss:$28 sps:$4 sm:$0xff]   ;;  %v3859_v39 = vld [vmem:[%s5250_s5 + $0x50] ss:$28 sps:$4 sm:$0xff]  }
 0x21c   :  { %2699 = vmatprep.subr.bf16.mxu0 %v3786_v40  ;;  %2781 = vmatprep.subr.bf16.mxu1 %v3789_v41  ;;  %v3862_v40 = vld [vmem:[%s5250_s5 + $0x84] ss:$28 sps:$4 sm:$0xff]  }
 0x21d   :  { %v3863_v41 = vld [vmem:[%s5250_s5 + $0x248] ss:$28 sps:$4 sm:$0xff]  }
 0x21f   :  { %2700 = vmatpush1.bf16.msra.mxu0 %v3784_v42  ;;  %2782 = vmatpush1.bf16.msra.mxu1 %v3787_v44  ;;  %v3860_v42 = vld [vmem:[%s5250_s5 + $0x80] ss:$28 sps:$4 sm:$0xff]  }
 0x220   :  { %2701 = vmatprep.subr.bf16.mxu0 %v3792_v45  ;;  %2783 = vmatprep.subr.bf16.mxu1 %v3795_v23  ;;  %v3867_v44 = vld [vmem:[%s5250_s5 + $0xbc] ss:$28 sps:$4 sm:$0xff]  }
 0x221   :  { %v3868_v45 = vld [vmem:[%s5250_s5 + $0x280] ss:$28 sps:$4 sm:$0xff]   ;;  %v3865_v23 = vld [vmem:[%s5250_s5 + $0xb8] ss:$28 sps:$4 sm:$0xff]  }
 0x223   :  { %2702 = vmatpush1.bf16.msra.mxu0 %v3790_v46  ;;  %2784 = vmatpush1.bf16.msra.mxu1 %v3793_v47  ;;  %v3869_v46 = vld [vmem:[%s5250_s5 + $0xc0] ss:$28 sps:$4 sm:$0xff]   ;;  %v3872_v47 = vld [vmem:[%s5250_s5 + $0xf4] ss:$28 sps:$4 sm:$0xff]  }
 0x224   :  { %2703 = vmatprep.subr.bf16.mxu0 %v3798_v48  ;;  %2785 = vmatprep.subr.bf16.mxu1 %v3801_v49  ;;  %v3873_v48 = vld [vmem:[%s5250_s5 + $0x2b8] ss:$28 sps:$4 sm:$0xff]   ;;  %v3870_v49 = vld [vmem:[%s5250_s5 + $0xf0] ss:$28 sps:$4 sm:$0xff]  }
 0x227   :  { %2704 = vmatpush1.bf16.msra.mxu0 %v3796_v50  ;;  %2786 = vmatpush1.bf16.msra.mxu1 %v3799_v51  ;;  %v3874_v50 = vld [vmem:[%s5250_s5 + $0xf8] ss:$28 sps:$4 sm:$0xff]   ;;  %v3877_v51 = vld [vmem:[%s5250_s5 + $0x12c] ss:$28 sps:$4 sm:$0xff]  }
 0x228   :  { %2705 = vmatprep.subr.bf16.mxu0 %v3804_v52  ;;  %2787 = vmatprep.subr.bf16.mxu1 %v3807_v53  ;;  %v3878_v52 = vld [vmem:[%s5250_s5 + $0x2f0] ss:$28 sps:$4 sm:$0xff]   ;;  %v3875_v53 = vld [vmem:[%s5250_s5 + $0x128] ss:$28 sps:$4 sm:$0xff]  }
 0x22b   :  { %2706 = vmatpush1.bf16.msra.mxu0 %v3802_v54  ;;  %2788 = vmatpush1.bf16.msra.mxu1 %v3805_v55  ;;  %v3879_v54 = vld [vmem:[%s5250_s5 + $0x130] ss:$28 sps:$4 sm:$0xff]   ;;  %v3882_v55 = vld [vmem:[%s5250_s5 + $0x164] ss:$28 sps:$4 sm:$0xff]  }
 0x22c   :  { %2707 = vmatprep.subr.bf16.mxu0 %v3810_v56  ;;  %2789 = vmatprep.subr.bf16.mxu1 %v3813_v57  ;;  %v3883_v56 = vld [vmem:[%s5250_s5 + $0x328] ss:$28 sps:$4 sm:$0xff]   ;;  %v3880_v57 = vld [vmem:[%s5250_s5 + $0x160] ss:$28 sps:$4 sm:$0xff]  }
 0x22f   :  { %2708 = vmatpush1.bf16.msra.mxu0 %v3808_v58  ;;  %2790 = vmatpush1.bf16.msra.mxu1 %v3811_v59  ;;  %v3884_v58 = vld [vmem:[%s5250_s5 + $0x168] ss:$28 sps:$4 sm:$0xff]   ;;  %v3887_v59 = vld [vmem:[%s5250_s5 + $0x19c] ss:$28 sps:$4 sm:$0xff]  }
 0x230   :  { %2709 = vmatprep.subr.bf16.mxu0 %v3816_v61  ;;  %2791 = vmatprep.subr.bf16.mxu1 %v3819_v62  ;;  %v3888_v61 = vld [vmem:[%s5250_s5 + $0x360] ss:$28 sps:$4 sm:$0xff]   ;;  %v3885_v62 = vld [vmem:[%s5250_s5 + $0x198] ss:$28 sps:$4 sm:$0xff]  }
 0x233   :  { %2710 = vmatpush1.bf16.msra.mxu0 %v3814_v63  ;;  %2792 = vmatpush1.bf16.msra.mxu1 %v3817_v0  ;;  %v3889_v63 = vld [vmem:[%s5250_s5 + $0x1a0] ss:$28 sps:$4 sm:$0xff]   ;;  %v3892_v0 = vld [vmem:[%s5250_s5 + $0x1d4] ss:$28 sps:$4 sm:$0xff]  }
 0x234   :  { %2711 = vmatprep.subr.bf16.mxu0 %v3822_v2  ;;  %2793 = vmatprep.subr.bf16.mxu1 %v3825_v3  ;;  %v3893_v2 = vld [vmem:[%s5250_s5 + $0x558] ss:$28 sps:$4 sm:$0xff]   ;;  %v3890_v3 = vld [vmem:[%s5250_s5 + $0x1d0] ss:$28 sps:$4 sm:$0xff]  }
 0x237   :  { %2712 = vmatpush1.bf16.msra.mxu0 %v3820_v4  ;;  %2794 = vmatpush1.bf16.msra.mxu1 %v3823_v5  ;;  %v3894_v4 = vld [vmem:[%s5250_s5 + $0x398] ss:$28 sps:$4 sm:$0xff]   ;;  %v3897_v5 = vld [vmem:[%s5250_s5 + $0x20c] ss:$28 sps:$4 sm:$0xff]  }
 0x238   :  { %2713 = vmatprep.subr.bf16.mxu0 %v3828_v6  ;;  %2795 = vmatprep.subr.bf16.mxu1 %v3831_v7  ;;  %v3898_v6 = vld [vmem:[%s5250_s5 + $0x590] ss:$28 sps:$4 sm:$0xff]   ;;  %v3895_v7 = vld [vmem:[%s5250_s5 + $0x208] ss:$28 sps:$4 sm:$0xff]  }
 0x23b   :  { %2714 = vmatpush1.bf16.msra.mxu0 %v3826_v8  ;;  %2796 = vmatpush1.bf16.msra.mxu1 %v3829_v9  ;;  %v3899_v8 = vld [vmem:[%s5250_s5 + $0x3d0] ss:$28 sps:$4 sm:$0xff]   ;;  %v3902_v9 = vld [vmem:[%s5250_s5 + $0x244] ss:$28 sps:$4 sm:$0xff]  }
 0x23c   :  { %2715 = vmatprep.subr.bf16.mxu0 %v3834_v10  ;;  %2797 = vmatprep.subr.bf16.mxu1 %v3837_v11  ;;  %v3903_v10 = vld [vmem:[%s5250_s5 + $0x5c8] ss:$28 sps:$4 sm:$0xff]   ;;  %v3900_v11 = vld [vmem:[%s5250_s5 + $0x240] ss:$28 sps:$4 sm:$0xff]  }
 0x23f   :  { %2716 = vmatpush1.bf16.msra.mxu0 %v3832_v12  ;;  %2798 = vmatpush1.bf16.msra.mxu1 %v3835_v13  ;;  %v3904_v12 = vld [vmem:[%s5250_s5 + $0x408] ss:$28 sps:$4 sm:$0xff]   ;;  %v3907_v13 = vld [vmem:[%s5250_s5 + $0x27c] ss:$28 sps:$4 sm:$0xff]  }
 0x240   :  { %2717 = vmatprep.subr.bf16.mxu0 %v3840_v16  ;;  %2799 = vmatprep.subr.bf16.mxu1 %v3843_v18  ;;  %v3905_v16 = vld [vmem:[%s5250_s5 + $0x278] ss:$28 sps:$4 sm:$0xff]   ;;  %v3909_v18 = vld [vmem:[%s5250_s5 + $0x440] ss:$28 sps:$4 sm:$0xff]  }
 0x243   :  { %2718 = vmatpush1.bf16.msra.mxu0 %v3838_v19  ;;  %2800 = vmatpush1.bf16.msra.mxu1 %v3841_v60  ;;  %v3912_v19 = vld [vmem:[%s5250_s5 + $0x2b4] ss:$28 sps:$4 sm:$0xff]  }
 0x244   :  { %2719 = vmatprep.subr.bf16.mxu0 %v3846_v26  ;;  %2801 = vmatprep.subr.bf16.mxu1 %v3849_v27  ;;  %v3913_v60 = vld [vmem:[%s5250_s5 + $0x638] ss:$28 sps:$4 sm:$0xff]   ;;  %v3917_v27 = vld [vmem:[%s5250_s5 + $0x2ec] ss:$28 sps:$4 sm:$0xff]  }
 0x245   :  { %v3914_v26 = vld [vmem:[%s5250_s5 + $0x478] ss:$28 sps:$4 sm:$0xff]  }
 0x247   :  { %2720 = vmatpush1.bf16.msra.mxu0 %v3844_v28  ;;  %2802 = vmatpush1.bf16.msra.mxu1 %v3847_v1  ;;  %v3918_v28 = vld [vmem:[%s5250_s5 + $0x670] ss:$28 sps:$4 sm:$0xff]   ;;  %v3915_v1 = vld [vmem:[%s5250_s5 + $0x2e8] ss:$28 sps:$4 sm:$0xff]  }
 0x248   :  { %2812 = vmatprep.subr.bf16.mxu0 %v3852_v30  ;;  %3366 = vmatprep.subr.bf16.mxu1 %v3853_v31  ;;  %v3922_v30 = vld [vmem:[%s5250_s5 + $0x324] ss:$28 sps:$4 sm:$0xff]  }
 0x249   :  { %v3923_v31 = vld [vmem:[%s5250_s5 + $0x6a8] ss:$28 sps:$4 sm:$0xff]  }
 0x24a   :  { %2722 = vmatmul.mubr.bf16.vlgmr.msra.gmra.mrb[4].mxu0 %v4932_v33  ;;  %2804 = vmatmul.mubr.bf16.vlgmr.msra.gmra.mrb[12].mxu1 %v4932_v33 }
 0x24b   :  { %2813 = vmatpush1.bf16.msra.mxu0 %v3850_v32  ;;  %2844 = vmatprep.mubr.bf16.mxu0 %v4722_v14  ;;  %v3920_v32 = vld [vmem:[%s5250_s5 + $0x320] ss:$28 sps:$4 sm:$0xff]  }
 0x24c   :  { %3367 = vmatpush3.bf16.msra.mxu1 %v3854_v34  ;;  %2926 = vmatprep.mubr.bf16.mxu1 %v4722_v14  ;;  %v3864_v14 = vld [vmem:[%s5250_s5 + $0x88] ss:$28 sps:$4 sm:$0xff]  }
 0x24d   :  { %2814 = vmatprep.subr.bf16.mxu0 %v3857_v35  ;;  %3368 = vmatprep.subr.bf16.mxu1 %v3858_v37  ;;  %v3924_v34 = vld [vmem:[%s5250_s5 + $0x4e8] ss:$28 sps:$4 sm:$0xff]   ;;  %v3927_v35 = vld [vmem:[%s5250_s5 + $0x35c] ss:$28 sps:$4 sm:$0xff]  }
 0x24e   :  { %v3928_v37 = vld [vmem:[%s5250_s5 + $0x6e0] ss:$28 sps:$4 sm:$0xff]  }
 0x24f   :  { %2815 = vmatpush1.bf16.msra.mxu0 %v3855_v38  ;;  %v3925_v38 = vld [vmem:[%s5250_s5 + $0x358] ss:$28 sps:$4 sm:$0xff]  }
 0x250   :  { %3369 = vmatpush3.bf16.msra.mxu1 %v3859_v39  ;;  %2816 = vmatprep.subr.bf16.mxu0 %v3862_v40  ;;  %v3929_v39 = vld [vmem:[%s5250_s5 + $0x520] ss:$28 sps:$4 sm:$0xff]   ;;  %v3932_v40 = vld [vmem:[%s5250_s5 + $0x394] ss:$28 sps:$4 sm:$0xff]  }
 0x251   :  { %3370 = vmatprep.subr.bf16.mxu1 %v3863_v41  ;;  %v3930_v41 = vld [vmem:[%s5250_s5 + $0x390] ss:$28 sps:$4 sm:$0xff]  }
 0x253   :  { %2817 = vmatpush1.bf16.msra.mxu0 %v3860_v42  ;;  %v3935_v42 = vld [vmem:[%s5250_s5 + $0x3cc] ss:$28 sps:$4 sm:$0xff]  }
 0x254   :  { %3371 = vmatpush3.bf16.msra.mxu1 %v3864_v14  ;;  %2818 = vmatprep.subr.bf16.mxu0 %v3867_v44  ;;  %v3933_v14 = vld [vmem:[%s5250_s5 + $0x3c8] ss:$28 sps:$4 sm:$0xff]  }
 0x255   :  { %3372 = vmatprep.subr.bf16.mxu1 %v3868_v45  ;;  %v3938_v44 = vld [vmem:[%s5250_s5 + $0x404] ss:$28 sps:$4 sm:$0xff]  }
 0x256   :  { %v3936_v45 = vld [vmem:[%s5250_s5 + $0x400] ss:$28 sps:$4 sm:$0xff]  }
 0x257   :  { %2819 = vmatpush1.bf16.msra.mxu0 %v3865_v23  ;;  %v3944_v23 = vld [vmem:[%s5250_s5 + $0x474] ss:$28 sps:$4 sm:$0xff]  }
 0x258   :  { %3373 = vmatpush3.bf16.msra.mxu1 %v3869_v46  ;;  %2820 = vmatprep.subr.bf16.mxu0 %v3872_v47  ;;  %v3942_v46 = vld [vmem:[%s5250_s5 + $0x470] ss:$28 sps:$4 sm:$0xff]  }
 0x259   :  { %3374 = vmatprep.subr.bf16.mxu1 %v3873_v48  ;;  %v3947_v47 = vld [vmem:[%s5250_s5 + $0x4ac] ss:$28 sps:$4 sm:$0xff]  }
 0x25a   :  { %v3945_v48 = vld [vmem:[%s5250_s5 + $0x4a8] ss:$28 sps:$4 sm:$0xff]  }
 0x25b   :  { %2821 = vmatpush1.bf16.msra.mxu0 %v3870_v49  ;;  %v3950_v49 = vld [vmem:[%s5250_s5 + $0x4e4] ss:$28 sps:$4 sm:$0xff]  }
 0x25c   :  { %3375 = vmatpush3.bf16.msra.mxu1 %v3874_v50  ;;  %2822 = vmatprep.subr.bf16.mxu0 %v3877_v51  ;;  %v3948_v50 = vld [vmem:[%s5250_s5 + $0x4e0] ss:$28 sps:$4 sm:$0xff]  }
 0x25d   :  { %3376 = vmatprep.subr.bf16.mxu1 %v3878_v52  ;;  %v3953_v51 = vld [vmem:[%s5250_s5 + $0x51c] ss:$28 sps:$4 sm:$0xff]  }
 0x25e   :  { %v3951_v52 = vld [vmem:[%s5250_s5 + $0x518] ss:$28 sps:$4 sm:$0xff]  }
 0x25f   :  { %2823 = vmatpush1.bf16.msra.mxu0 %v3875_v53  ;;  %v3956_v53 = vld [vmem:[%s5250_s5 + $0x554] ss:$28 sps:$4 sm:$0xff]  }
 0x260   :  { %3377 = vmatpush3.bf16.msra.mxu1 %v3879_v54  ;;  %2824 = vmatprep.subr.bf16.mxu0 %v3882_v55  ;;  %v3954_v54 = vld [vmem:[%s5250_s5 + $0x550] ss:$28 sps:$4 sm:$0xff]  }
 0x261   :  { %3378 = vmatprep.subr.bf16.mxu1 %v3883_v56  ;;  %v3959_v55 = vld [vmem:[%s5250_s5 + $0x58c] ss:$28 sps:$4 sm:$0xff]  }
 0x262   :  { %v3957_v56 = vld [vmem:[%s5250_s5 + $0x588] ss:$28 sps:$4 sm:$0xff]  }
 0x263   :  { %2825 = vmatpush1.bf16.msra.mxu0 %v3880_v57  ;;  %v3962_v57 = vld [vmem:[%s5250_s5 + $0x5c4] ss:$28 sps:$4 sm:$0xff]  }
 0x264   :  { %3379 = vmatpush3.bf16.msra.mxu1 %v3884_v58  ;;  %2826 = vmatprep.subr.bf16.mxu0 %v3887_v59  ;;  %v3960_v58 = vld [vmem:[%s5250_s5 + $0x5c0] ss:$28 sps:$4 sm:$0xff]  }
 0x265   :  { %3380 = vmatprep.subr.bf16.mxu1 %v3888_v61  ;;  %v3965_v59 = vld [vmem:[%s5250_s5 + $0x5fc] ss:$28 sps:$4 sm:$0xff]  }
 0x266   :  { %v3963_v61 = vld [vmem:[%s5250_s5 + $0x5f8] ss:$28 sps:$4 sm:$0xff]  }
 0x267   :  { %2827 = vmatpush1.bf16.msra.mxu0 %v3885_v62  ;;  %v3968_v62 = vld [vmem:[%s5250_s5 + $0x634] ss:$28 sps:$4 sm:$0xff]  }
 0x268   :  { %3381 = vmatpush3.bf16.msra.mxu1 %v3889_v63  ;;  %2828 = vmatprep.subr.bf16.mxu0 %v3892_v0  ;;  %v3966_v63 = vld [vmem:[%s5250_s5 + $0x630] ss:$28 sps:$4 sm:$0xff]  }
 0x269   :  { %3388 = vmatprep.subr.bf16.mxu1 %v3893_v2  ;;  %v3971_v0 = vld [vmem:[%s5250_s5 + $0x66c] ss:$28 sps:$4 sm:$0xff]  }
 0x26a   :  { %v3969_v2 = vld [vmem:[%s5250_s5 + $0x668] ss:$28 sps:$4 sm:$0xff]  }
 0x26b   :  { %2927 = vmatmul.mubr.bf16.vlgmr.msra.gmra.mrb[16].mxu1 %v4730_v17  ;;  %2829 = vmatpush1.bf16.msra.mxu0 %v3890_v3  ;;  %v3974_v3 = vld [vmem:[%s5250_s5 + $0x6a4] ss:$28 sps:$4 sm:$0xff]  }
 0x26c   :  { %3389 = vmatpush3.bf16.msra.mxu1 %v3894_v4  ;;  %2966 = vmatprep.mubr.bf16.mxu1 %v4740_v20  ;;  %v3972_v4 = vld [vmem:[%s5250_s5 + $0x6a0] ss:$28 sps:$4 sm:$0xff]  }
 0x26d   :  { %2830 = vmatprep.subr.bf16.mxu0 %v3897_v5  ;;  %3390 = vmatprep.subr.bf16.mxu1 %v3898_v6  ;;  %v3977_v5 = vld [vmem:[%s5250_s5 + $0x6dc] ss:$28 sps:$4 sm:$0xff]  }
 0x26e   :  { %v3975_v6 = vld [vmem:[%s5250_s5 + $0x6d8] ss:$28 sps:$4 sm:$0xff]  }
 0x26f   :  { %2831 = vmatpush1.bf16.msra.mxu0 %v3895_v7  ;;  %v1459_v7 = vld [vmem:[%s5251_s6] sm:$0x7f] }
 0x270   :  { %3391 = vmatpush3.bf16.msra.mxu1 %v3899_v8  ;;  %2832 = vmatprep.subr.bf16.mxu0 %v3902_v9  ;;  %v1464_v8 = vrot.slane %v1459_v7, %v4298_v22  ;;  %v1472_v9 = vrot.slane %v1459_v7, %v4470_v36 }
 0x271   :  { %3392 = vmatprep.subr.bf16.mxu1 %v3903_v10  ;;  %v1468_v10 = vrot.slane %v1459_v7, %v4306_v24 }
 0x273   :  { %2833 = vmatpush1.bf16.msra.mxu0 %v3900_v11  ;;  %v1476_v11 = vrot.slane %v1459_v7, %v4331_v43 }
 0x274   :  { %3393 = vmatpush3.bf16.msra.mxu1 %v3904_v12  ;;  %2834 = vmatprep.subr.bf16.mxu0 %v3907_v13 }
 0x275   :  { %3394 = vmatprep.subr.bf16.mxu1 %v3908_v15 }
 0x277   :  { %2835 = vmatpush1.bf16.msra.mxu0 %v3905_v16 }
 0x278   :  { %3395 = vmatpush3.bf16.msra.mxu1 %v3909_v18  ;;  %2836 = vmatprep.subr.bf16.mxu0 %v3912_v19 }
 0x279   :  { %3396 = vmatprep.subr.bf16.mxu1 %v3913_v60 }
 0x27b   :  { %2837 = vmatpush1.bf16.msra.mxu0 %v3910_v25 }
 0x27c   :  { %3397 = vmatpush3.bf16.msra.mxu1 %v3914_v26  ;;  %2838 = vmatprep.subr.bf16.mxu0 %v3917_v27 }
 0x27d   :  { %3398 = vmatprep.subr.bf16.mxu1 %v3918_v28 }
 0x27f   :  { %2839 = vmatpush1.bf16.msra.mxu0 %v3915_v1 }
 0x280   :  { %3399 = vmatpush3.bf16.msra.mxu1 %v3919_v29  ;;  %2840 = vmatprep.subr.bf16.mxu0 %v3922_v30  ;;  %v1487_v29 = vsub.s32 6, %v4295_v21 }
 0x281   :  { %3400 = vmatprep.subr.bf16.mxu1 %v3923_v31 }
 0x282   :  { %v1488_v30 = vrot.slane %v1459_v7, %v1487_v29 }
 0x283   :  { %2841 = vmatpush1.bf16.msra.mxu0 %v3920_v32 }
 0x284   :  { %3401 = vmatpush3.bf16.msra.mxu1 %v3924_v34  ;;  %2842 = vmatprep.subr.bf16.mxu0 %v3927_v35 }
 0x285   :  { %3402 = vmatprep.subr.bf16.mxu1 %v3928_v37 }
 0x287   :  { %2843 = vmatpush1.bf16.msra.mxu0 %v3925_v38 }
 0x288   :  { %3403 = vmatpush3.bf16.msra.mxu1 %v3929_v39  ;;  %2853 = vmatprep.subr.bf16.mxu0 %v3932_v40  ;;  %v1479_v40 = vsub.s32 4, %v4295_v21 }
 0x28a   :  { %2845 = vmatmul.mubr.bf16.vlgmr.msra.gmra.mrb[8].mxu0 %v4730_v17  ;;  %v3941_v17 = vld [vmem:[%s5250_s5 + $0x43c] ss:$28 sps:$4 sm:$0xff]  }
 0x28b   :  { %2967 = vmatmul.mubr.bf16.vlgmr.msra.gmra.mrb[20].mxu1 %v4932_v33  ;;  %2854 = vmatpush1.bf16.msra.mxu0 %v3930_v41  ;;  %v1483_v41 = vsub.s32 5, %v4295_v21 }
 0x28c   :  { %2885 = vmatprep.mubr.bf16.mxu0 %v4740_v20  ;;  %2855 = vmatprep.subr.bf16.mxu0 %v3935_v42  ;;  %v3939_v20 = vld [vmem:[%s5250_s5 + $0x438] ss:$28 sps:$4 sm:$0xff]   ;;  %v1480_v42 = vrot.slane %v1459_v7, %v1479_v40  ;;  %s4003_s5 = smov [#allocation2]  }
 0x28d   :  { %s2988_s6 = sshll.u32 %s4003_s5, 4  ;;  %s2989_s6 = int_to_ptr.vmem [resolvable:$true] %s2988_s6 }
 0x28e   :  { %s3978_s3 = scalar_lea.vmem %s2989_s6, 896  ;;  %p3983_p1 = scmp.lt.s32.totalorder %s2989_s6, %s2989_s6 }
 0x28f   :  { %2856 = vmatpush1.bf16.msra.mxu0 %v3933_v14  ;;  %v1484_v14 = vrot.slane %v1459_v7, %v1483_v41  ;;  %p3979_p0 = scmp.ne.s32.totalorder %s2989_s6, %s3978_s3  ;;  %p3984_p2 = scmp.lt.s32.totalorder %s3978_s3, %s3978_s3 }
 0x290   :  { %2857 = vmatprep.subr.bf16.mxu0 %v3938_v44 }
 0x291   :  { %p3985_p3 = por %p3984_p2, %p3983_p1 }
 0x293   :  { %2858 = vmatpush1.bf16.msra.mxu0 %v3936_v45  ;;  %p3986_p4 = pnand %p3985_p3, %p3979_p0 }
 0x294   :  { %2859 = vmatprep.subr.bf16.mxu0 %v3941_v17 }
 0x297   :  { %2860 = vmatpush1.bf16.msra.mxu0 %v3939_v20 }
 0x298   :  { %2861 = vmatprep.subr.bf16.mxu0 %v3944_v23 }
 0x29b   :  { %2862 = vmatpush1.bf16.msra.mxu0 %v3942_v46 }
 0x29c   :  { %2863 = vmatprep.subr.bf16.mxu0 %v3947_v47 }
 0x29f   :  { %2864 = vmatpush1.bf16.msra.mxu0 %v3945_v48 }
 0x2a0   :  { %2865 = vmatprep.subr.bf16.mxu0 %v3950_v49 }
 0x2a3   :  { %2866 = vmatpush1.bf16.msra.mxu0 %v3948_v50 }
 0x2a4   :  { %2867 = vmatprep.subr.bf16.mxu0 %v3953_v51 }
 0x2a7   :  { %2868 = vmatpush1.bf16.msra.mxu0 %v3951_v52 }
 0x2a8   :  { %2869 = vmatprep.subr.bf16.mxu0 %v3956_v53 }
 0x2ab   :  { %2870 = vmatpush1.bf16.msra.mxu0 %v3954_v54 }
 0x2ac   :  { %2871 = vmatprep.subr.bf16.mxu0 %v3959_v55 }
 0x2af   :  { %2872 = vmatpush1.bf16.msra.mxu0 %v3957_v56 }
 0x2b0   :  { %2873 = vmatprep.subr.bf16.mxu0 %v3962_v57 }
 0x2b3   :  { %2874 = vmatpush1.bf16.msra.mxu0 %v3960_v58 }
 0x2b4   :  { %2875 = vmatprep.subr.bf16.mxu0 %v3965_v59 }
 0x2b7   :  { %2876 = vmatpush1.bf16.msra.mxu0 %v3963_v61 }
 0x2b8   :  { %2877 = vmatprep.subr.bf16.mxu0 %v3968_v62 }
 0x2bb   :  { %2878 = vmatpush1.bf16.msra.mxu0 %v3966_v63 }
 0x2bc   :  { %2879 = vmatprep.subr.bf16.mxu0 %v3971_v0 }
 0x2bf   :  { %2880 = vmatpush1.bf16.msra.mxu0 %v3969_v2 }
 0x2c0   :  { %2881 = vmatprep.subr.bf16.mxu0 %v3974_v3 }
 0x2c3   :  { %2882 = vmatpush1.bf16.msra.mxu0 %v3972_v4 }
 0x2c4   :  { %2883 = vmatprep.subr.bf16.mxu0 %v3977_v5 }
 0x2c7   :  { %2884 = vmatpush1.bf16.msra.mxu0 %v3975_v6 }
 0x2ca   :  { %2886 = vmatmul.mubr.bf16.vlgmr.msra.gmra.mrb[8].mxu0 %v4932_v33 }
 0x31d   :  { %v2723_v12 = vpop.f32.mrb[4].mxu0  ;;  %v2805_v13 = vpop.f32.mrb[12].mxu1 }
 0x31e   :  { %v3414_v15 = vadd.f32 %v2723_v12, %v1464_v8  ;;  %v3416_v16 = vadd.f32 %v2805_v13, %v1472_v9  ;;  %v2725_v18 = vpop.f32.mrb[5].mxu0  ;;  %v2807_v19 = vpop.f32.mrb[13].mxu1 }
 0x31f   :  { %v3415_v60 = vadd.f32 %v2725_v18, %v1468_v10  ;;  %v3417_v33 = vadd.f32 %v2807_v19, %v1476_v11  ;;  %v2727_v25 = vpop.f32.mrb[6].mxu0  ;;  %v2809_v26 = vpop.f32.mrb[14].mxu1 }
 0x320   :  { %2974 = vst [vmem:[#allocation2] sm:$0xff] %v3414_v15  ;;  %2976 = vst [vmem:[#allocation2 + $0x10] sm:$0xff] %v3416_v16  ;;  %v2728_v27 = vpop.f32.mrb[7].mxu0  ;;  %v2810_v22 = vpop.f32.mrb[15].mxu1 }
 0x321   :  { %2975 = vst [vmem:[#allocation2 + $0x8] sm:$0xff] %v3415_v60  ;;  %2977 = vst [vmem:[#allocation2 + $0x18] sm:$0xff] %v3417_v33 }
 0x33e   :  { %v3382_v36 = vpop.f32.mrb[16].mxu1 }
 0x33f   :  { %v3383_v24 = vpop.f32.mrb[17].mxu1 }
 0x340   :  { %v3384_v28 = vadd.f32 %v3383_v24, %v3382_v36  ;;  %v3385_v43 = vpop.f32.mrb[18].mxu1 }
 0x341   :  { %v3386_v1 = vpop.f32.mrb[19].mxu1 }
 0x342   :  { %v2929_v34 = vadd.f32 %v3384_v28, %v1488_v30 }
 0x35e   :  { %v3404_v31 = vpop.f32.mrb[20].mxu1 }
 0x35f   :  { %v3405_v32 = vpop.f32.mrb[21].mxu1 }
 0x360   :  { %v3406_v35 = vadd.f32 %v3405_v32, %v3404_v31  ;;  %v3407_v37 = vpop.f32.mrb[22].mxu1 }
 0x361   :  { %v3408_v38 = vpop.f32.mrb[23].mxu1 }
 0x362   :  { %v2969_v39 = vadd.f32 %v3406_v35, %v2929_v34 }
 0x364   :  { %2981 = vst.msk [vmem:[#allocation2 + $0x30] sm:$0xff] %vm2980_vm1, %v2969_v39 }
 0x39d   :  { %v2887_v44 = vpop.f32.mrb[8].mxu0 }
 0x39e   :  { %v3418_v45 = vadd.f32 %v2887_v44, %v1480_v42  ;;  %v2889_v17 = vpop.f32.mrb[9].mxu0 }
 0x39f   :  { %v3419_v20 = vadd.f32 %v2889_v17, %v1484_v14  ;;  %v2891_v23 = vpop.f32.mrb[10].mxu0 }
 0x3a0   :  { %2978 = vst [vmem:[#allocation2 + $0x20] sm:$0xff] %v3418_v45  ;;  %v2892_v46 = vpop.f32.mrb[11].mxu0 }
 0x3a1   :  { %2979 = vst [vmem:[#allocation2 + $0x28] sm:$0xff] %v3419_v20 }
 0x3a2   :  { %3989 = shalt.err (!%p3986_p4)
}
 0x3a3   :  { %s3990_s23 = scalar_lea.hbm %s5252_s7, 896 }
 0x3a4   :  { %p3991_p5 = scmp.ne.s32.totalorder %s5252_s7, %s3990_s23  ;;  %p3994_p6 = scmp.lt.u32.totalorder %s3990_s23, %s5252_s7 }
 0x3a6   :  { %p3996_p7 = pnand %p3994_p6, %p3991_p5 }
 0x3a8   :  { %3999 = shalt.err (!%p3996_p7)
}
 0x3a9   :  { %2991 = dma.vmem_to_hbm [thread:$0]  %s2989_s6, 896, %s5252_s7, [#allocation3]  }
 0x3aa   :  { %4000 = dma.done.wait [#allocation3], 896  }
 0x3ab   :  { %4001 = vsyncadd [#allocation3], 4294966400 }
 0x3ac   :  { %2995 = vsyncpa [#allocation3], 1 }

</bundles_post_ra>
